<compile_context>
chip_gen: v6e
topology: v6e:2x2x1
jax: 0.10.0
libtpu: 0.0.40
codegen_flags: <defaults>
</compile_context>

<pallas_src>
import functools
import math

import numpy as np
import jax
import jax.numpy as jnp
from jax.experimental import pallas as pl
from jax.experimental.pallas import tpu as pltpu


def _round_up(x, m):
    return ((x + m - 1) // m) * m


def _cdiv(a, b):
    return -(-a // b)


# ------------------------------ Pallas kernel --------------------------------
def _fused_conv_relu_kernel(cur_ref, nxt_ref, w_ref, b_ref,
                            o1_ref, o2_ref, o3_ref, *, C, C_pad, n_q, mxu_dtype):
    # cur_ref : (1, S, Tt)   polyphase rows of the current time tile
    #                        cur[0, s, r] = x[(tile_start + r) * S + s]
    # nxt_ref : (1, S, OV)   first OV polyphase rows of the NEXT tile (overlap)
    # w_ref   : (3*C_pad, K) stacked branch weights, natural tap order, zero-padded
    # b_ref   : (3*C_pad, 1) stacked biases (f32)
    # o*_ref  : (1, C, Tt)   per-branch outputs, time lane-dense
    cur = cur_ref[0]                                   # (S, Tt)  f32
    nxt = nxt_ref[0]                                   # (S, OV)  f32
    t_tile = cur.shape[-1]

    # Frame matrix built in VMEM: row (q*S + s), column t holds
    #   x[(frame + q) * S + s] == ext[s, t + q]        (frame = tile_start + t)
    # i.e. taps are laid out in natural order k = q*S + s, matching w_ref columns.
    ext = jnp.concatenate([cur, nxt], axis=-1)         # (S, Tt + OV)
    p = jnp.concatenate([ext[:, q:q + t_tile] for q in range(n_q)],
                        axis=0)                        # (K = n_q*S, Tt)

    # Optional in-register cast for the MXU multiply (f32 accumulation either way).
    w = w_ref[...].astype(mxu_dtype)
    p = p.astype(mxu_dtype)
    acc = jnp.dot(w, p, preferred_element_type=jnp.float32)   # (3*C_pad, Tt) f32

    acc = jnp.maximum(acc + b_ref[...], 0.0)           # bias + ReLU stay in f32
    o1_ref[0, :, :] = acc[0:C, :].astype(o1_ref.dtype)
    o2_ref[0, :, :] = acc[C_pad:C_pad + C, :].astype(o2_ref.dtype)
    o3_ref[0, :, :] = acc[2 * C_pad:2 * C_pad + C, :].astype(o3_ref.dtype)


def _fused_encoder_call(xp, w_all, b_all, *, C, C_pad, n_q, t_tile, ov, out_T,
                        mxu_dtype, out_dtype, vmem_limit_bytes):
    """xp: (B, S, n_rows) polyphase signal; w_all: (3*C_pad, K); b_all: (3*C_pad, 1)."""
    B, S, n_rows = xp.shape
    N_pad, K_full = w_all.shape
    num_tiles = _cdiv(out_T, t_tile)
    nxt_stride = t_tile // ov                     # t_tile is a multiple of ov
    grid = (B, num_tiles)

    out_sds = jax.ShapeDtypeStruct((B, C, out_T), out_dtype)
    # C equals the full dim and t_tile is a multiple of 128 -> unmasked lane-dense
    # stores for interior blocks; only the ragged final time block is masked.
    out_spec = pl.BlockSpec((1, C, t_tile), lambda b, j: (b, 0, j))

    flops = 2 * B * num_tiles * t_tile * N_pad * K_full
    bytes_accessed = (xp.size * xp.dtype.itemsize
                      + w_all.size * w_all.dtype.itemsize
                      + b_all.size * b_all.dtype.itemsize
                      + 3 * B * C * out_T * jnp.dtype(out_dtype).itemsize)

    kernel = functools.partial(_fused_conv_relu_kernel,
                               C=C, C_pad=C_pad, n_q=n_q, mxu_dtype=mxu_dtype)
    return pl.pallas_call(
        kernel,
        out_shape=(out_sds, out_sds, out_sds),
        grid_spec=pltpu.PrefetchScalarGridSpec(
            num_scalar_prefetch=0,
            grid=grid,
            in_specs=[
                # current tile of polyphase rows
                pl.BlockSpec((1, S, t_tile), lambda b, j: (b, 0, j)),
                # small overlap window at the start of the next tile
                pl.BlockSpec((1, S, ov),
                             lambda b, j: (b, 0, (j + 1) * nxt_stride)),
                # stacked weights / biases (resident, constant block index)
                pl.BlockSpec((N_pad, K_full), lambda b, j: (0, 0)),
                pl.BlockSpec((N_pad, 1), lambda b, j: (0, 0)),
            ],
            out_specs=(out_spec, out_spec, out_spec),
        ),
        compiler_params=pltpu.CompilerParams(
            dimension_semantics=("parallel", "parallel"),
            vmem_limit_bytes=vmem_limit_bytes),
        cost_estimate=pl.CostEstimate(flops=int(flops), transcendentals=0,
                                      bytes_accessed=int(bytes_accessed)),
    )(xp, xp, w_all, b_all)


# ------------------------------ module wrapper --------------------------------
class SharedEncoderPallas:
    def __init__(self, encoder_kernel_size, L1, L2, L3, key, *,
                 max_time_tile=2048, mxu_dtype=jnp.float32,
                 out_dtype=jnp.float32, vmem_limit_bytes=None):
        self.C = encoder_kernel_size          # Conv1d out_channels (PyTorch naming)
        self.L1, self.L2, self.L3 = L1, L2, L3
        self.stride = L1 // 2
        assert self.stride >= 1, "L1 must be >= 2"
        self.mxu_dtype = jnp.dtype(mxu_dtype)   # bf16 opt-in for very large L3
        self.out_dtype = jnp.dtype(out_dtype)   # bf16 opt-in halves dominant bytes
        self.vmem_limit_bytes = vmem_limit_bytes

        # Polyphase framing geometry: each frame needs n_q consecutive polyphase
        # rows of `stride` samples; n_q*stride >= max(L1,L2,L3), padded so the
        # frame matrix sublane count is a multiple of 8 (extra taps are zero-weighted).
        Lmax = max(L1, L2, L3)
        n_q = _cdiv(Lmax, self.stride)
        while (n_q * self.stride) % 8:
            n_q += 1
        self.n_q = n_q
        self.K_full = n_q * self.stride
        # Overlap window (rows of the next tile needed by the last frames of a
        # tile), rounded up to a lane-aligned 128 multiple.
        self.ov = _round_up(max(n_q - 1, 1), 128)
        self.max_time_tile = max(self.ov, _round_up(max_time_tile, self.ov))

        ks = jax.random.split(key, 6)

        def conv_params(kw, kb, kernel):
            # PyTorch Conv1d default init: U(-1/sqrt(fan_in), 1/sqrt(fan_in)), fan_in = kernel.
            bound = 1.0 / math.sqrt(kernel)
            w = jax.random.uniform(kw, (self.C, 1, kernel), jnp.float32, -bound, bound)
            b = jax.random.uniform(kb, (self.C,), jnp.float32, -bound, bound)
            return w, b

        self.w1, self.b1 = conv_params(ks[0], ks[1], L1)
        self.w2, self.b2 = conv_params(ks[2], ks[3], L2)
        self.w3, self.b3 = conv_params(ks[4], ks[5], L3)

        # Three branches stacked along the output-channel dim, each zero-padded
        # to K_full taps, so one MXU matmul serves all three branches exactly.
        self.C_pad = _round_up(self.C, 8)
        self.N_pad = 3 * self.C_pad
        w_all = jnp.zeros((self.N_pad, self.K_full), jnp.float32)
        w_all = w_all.at[0:self.C, 0:L1].set(self.w1[:, 0, :])
        w_all = w_all.at[self.C_pad:self.C_pad + self.C, 0:L2].set(self.w2[:, 0, :])
        w_all = w_all.at[2 * self.C_pad:2 * self.C_pad + self.C, 0:L3].set(self.w3[:, 0, :])
        b_all = jnp.zeros((self.N_pad, 1), jnp.float32)
        b_all = b_all.at[0:self.C, 0].set(self.b1)
        b_all = b_all.at[self.C_pad:self.C_pad + self.C, 0].set(self.b2)
        b_all = b_all.at[2 * self.C_pad:2 * self.C_pad + self.C, 0].set(self.b3)
        self.w_all = w_all                     # stays f32 in HBM (tiny)
        self.b_all = b_all

    def _align(self, x_1d):
        # Mirrors _align_num_frames_with_strides.  Note: the PyTorch module keys
        # `is_odd` off encoder_kernel_size (= its Conv1d out_channels); mirrored.
        T = x_1d.shape[-1]
        is_odd = self.C % 2
        num_strides = (T - is_odd) // self.stride
        num_rem = T - (is_odd + num_strides * self.stride)
        if num_rem == 0:
            return x_1d
        return jnp.pad(x_1d, ((0, 0), (0, self.stride - num_rem)))

    def __call__(self, x):
        # x: (B, T) float32 -> (z1, z2, z3), each (B, C, t_out) as in PyTorch.
        B, T = x.shape
        S = self.stride
        x_a = self._align(x)                               # (B, T_a), f32
        T_a = x_a.shape[-1]
        t_out = (T_a - self.L1) // S + 1
        assert t_out >= 1, "input too short for the short encoder kernel"

        # --------- adaptive, lane-aligned time tiling (review items 1 & 2) ----
        unit = self.ov                                     # multiple of 128
        if t_out >= unit:
            t_tile = min(self.max_time_tile, (t_out // unit) * unit)
            if B == 1:
                # keep >= 2 time blocks so both v7x TensorCores get work
                half = max(unit, (((t_out + 1) // 2) // unit) * unit)
                t_tile = min(t_tile, half)
            out_T, crop = t_out, 0                         # no wrapper crop
        else:
            # tiny-input fallback: one 128-wide block, cheap crop afterwards
            t_tile, out_T, crop = unit, unit, t_out
        num_tiles = _cdiv(out_T, t_tile)

        # --------- polyphase view of the raw signal (in-kernel framing) -------
        # xp[b, s, m] = x_pad[b, m*S + s]; padded with zeros so every tile plus
        # its overlap window is in-bounds (zeros beyond the signal reproduce the
        # PyTorch F.pad zeros for every branch; invalid frames are masked out).
        n_rows = num_tiles * t_tile + self.ov
        need = n_rows * S
        if need >= T_a:
            x_pad = jnp.pad(x_a, ((0, 0), (0, need - T_a)))
        else:                                              # defensive; not expected
            x_pad = x_a[:, :need]
        xp = x_pad.reshape(B, n_rows, S).transpose(0, 2, 1)   # (B, S, n_rows) f32

        z1, z2, z3 = _fused_encoder_call(
            xp, self.w_all, self.b_all,
            C=self.C, C_pad=self.C_pad, n_q=self.n_q, t_tile=t_tile,
            ov=self.ov, out_T=out_T, mxu_dtype=self.mxu_dtype,
            out_dtype=self.out_dtype, vmem_limit_bytes=self.vmem_limit_bytes)
        if crop:
            z1, z2, z3 = (z[:, :, :crop] for z in (z1, z2, z3))
        return z1, z2, z3


# ------------------------------ reference check -------------------------------
def _pad_or_crop_right(x_1d, pad):
    """Mimic F.pad(x, (0, pad)) incl. negative pad (= right crop). pad is static."""
    if pad > 0:
        return jnp.pad(x_1d, ((0, 0), (0, pad)))
    if pad < 0:
        return x_1d[:, :x_1d.shape[1] + pad]
    return x_1d


def _ref_conv_relu(x_1d, w, b, stride):
    # nn.Conv1d(1, C, K, stride) + ReLU in f32, NCL layout (exact-precision ref).
    y = jax.lax.conv_general_dilated(
        x_1d[:, None, :], w, window_strides=(stride,), padding="VALID",
        dimension_numbers=("NCH", "OIH", "NCH"),
        precision=jax.lax.Precision.HIGHEST)
    return jnp.maximum(y + b[None, :, None], 0.0)


if __name__ == "__main__":
    # Small module-consistent shapes.  Configs exercise: aligned input, ragged
    # (non-tile-multiple) frame counts, odd C (alignment quirk parity), and a
    # B == 1 call (>= 2 time blocks for v7x's two cores).
    configs = [
        dict(C=32, L1=4, L2=8, L3=16, B=2, T=2048),
        dict(C=32, L1=4, L2=8, L3=16, B=2, T=999),
        dict(C=17, L1=4, L2=8, L3=16, B=1, T=700),
    ]
    key = jax.random.PRNGKey(0)
    for cfg in configs:
        key, kp, kx = jax.random.split(key, 3)
        enc = SharedEncoderPallas(cfg["C"], cfg["L1"], cfg["L2"], cfg["L3"], kp)
        fwd = jax.jit(enc.__call__)
        x = jax.random.normal(kx, (cfg["B"], cfg["T"]), jnp.float32)
        z1, z2, z3 = fwd(x)
        jax.block_until_ready((z1, z2, z3))

        # Pure-JAX f32 reference of the PyTorch forward.
        stride = cfg["L1"] // 2
        x_a = enc._align(x)
        r1 = _ref_conv_relu(x_a, enc.w1, enc.b1, stride)
        padding_const = (r1.shape[-1] - 1) * stride - cfg["T"]
        r2 = _ref_conv_relu(_pad_or_crop_right(x_a, padding_const + cfg["L2"]),
                            enc.w2, enc.b2, stride)
        r3 = _ref_conv_relu(_pad_or_crop_right(x_a, padding_const + cfg["L3"]),
                            enc.w3, enc.b3, stride)

        for z, r in ((z1, r1), (z2, r2), (z3, r3)):
            assert z.shape == r.shape, (z.shape, r.shape)
            # Storage is f32 end-to-end; tolerance is kept conservative only to be
            # robust to per-generation MXU f32 pass configurations.
            np.testing.assert_allclose(np.asarray(z), np.asarray(r),
                                       rtol=1e-2, atol=1e-2)
    print("KERNEL_OK")
</pallas_src>

<mosaic_0001>
module attributes {stable_mosaic.version = 11 : i64} {
  func.func @_fused_conv_relu_kernel(%arg0: i32, %arg1: i32, %arg2: memref<1x2x896xf32, #tpu.memory_space<vmem>>, %arg3: memref<1x2x128xf32, #tpu.memory_space<vmem>>, %arg4: memref<96x16xf32, #tpu.memory_space<vmem>>, %arg5: memref<96x1xf32, #tpu.memory_space<vmem>>, %arg6: memref<1x32x896xf32, #tpu.memory_space<vmem>>, %arg7: memref<1x32x896xf32, #tpu.memory_space<vmem>>, %arg8: memref<1x32x896xf32, #tpu.memory_space<vmem>>) attributes {dimension_semantics = [#tpu.dimension_semantics<parallel>, #tpu.dimension_semantics<parallel>], iteration_bounds = array<i64: 2, 2>, scalar_prefetch = 0 : i64, scratch_operands = 0 : i64, tpu.core_type = #tpu.core_type<tc>, window_params = [{transform_indices = @transform_0, window_bounds = array<i64: 1, 2, 896>}, {transform_indices = @transform_1, window_bounds = array<i64: 1, 2, 128>}, {pipeline_mode = #tpu.pipeline_mode<synchronous>, transform_indices = @transform_2, window_bounds = array<i64: 96, 16>}, {pipeline_mode = #tpu.pipeline_mode<synchronous>, transform_indices = @transform_3, window_bounds = array<i64: 96, 1>}, {transform_indices = @transform_4, window_bounds = array<i64: 1, 32, 896>}, {transform_indices = @transform_5, window_bounds = array<i64: 1, 32, 896>}, {transform_indices = @transform_6, window_bounds = array<i64: 1, 32, 896>}]} {
    %c0 = arith.constant 0 : index
    %c0_0 = arith.constant 0 : index
    %c0_1 = arith.constant 0 : index
    %0 = vector.load %arg2[%c0, %c0_0, %c0_1] : memref<1x2x896xf32, #tpu.memory_space<vmem>>, vector<1x2x896xf32>
    %1 = vector.shape_cast %0 : vector<1x2x896xf32> to vector<2x896xf32>
    %c0_2 = arith.constant 0 : index
    %c0_3 = arith.constant 0 : index
    %c0_4 = arith.constant 0 : index
    %2 = vector.load %arg3[%c0_2, %c0_3, %c0_4] : memref<1x2x128xf32, #tpu.memory_space<vmem>>, vector<1x2x128xf32>
    %3 = vector.shape_cast %2 : vector<1x2x128xf32> to vector<2x128xf32>
    %4 = tpu.concatenate %1, %3 in 1 : vector<2x896xf32>, vector<2x128xf32> -> vector<2x1024xf32>
    %5 = vector.extract_strided_slice %4 {offsets = [0, 0], sizes = [2, 896], strides = [1, 1]} : vector<2x1024xf32> to vector<2x896xf32>
    %6 = vector.extract_strided_slice %4 {offsets = [0, 1], sizes = [2, 896], strides = [1, 1]} : vector<2x1024xf32> to vector<2x896xf32>
    %7 = vector.extract_strided_slice %4 {offsets = [0, 2], sizes = [2, 896], strides = [1, 1]} : vector<2x1024xf32> to vector<2x896xf32>
    %8 = vector.extract_strided_slice %4 {offsets = [0, 3], sizes = [2, 896], strides = [1, 1]} : vector<2x1024xf32> to vector<2x896xf32>
    %9 = vector.extract_strided_slice %4 {offsets = [0, 4], sizes = [2, 896], strides = [1, 1]} : vector<2x1024xf32> to vector<2x896xf32>
    %10 = vector.extract_strided_slice %4 {offsets = [0, 5], sizes = [2, 896], strides = [1, 1]} : vector<2x1024xf32> to vector<2x896xf32>
    %11 = vector.extract_strided_slice %4 {offsets = [0, 6], sizes = [2, 896], strides = [1, 1]} : vector<2x1024xf32> to vector<2x896xf32>
    %12 = vector.extract_strided_slice %4 {offsets = [0, 7], sizes = [2, 896], strides = [1, 1]} : vector<2x1024xf32> to vector<2x896xf32>
    %13 = tpu.concatenate %5, %6, %7, %8, %9, %10, %11, %12 in 0 : vector<2x896xf32>, vector<2x896xf32>, vector<2x896xf32>, vector<2x896xf32>, vector<2x896xf32>, vector<2x896xf32>, vector<2x896xf32>, vector<2x896xf32> -> vector<16x896xf32>
    %c0_5 = arith.constant 0 : index
    %c0_6 = arith.constant 0 : index
    %14 = vector.load %arg4[%c0_5, %c0_6] : memref<96x16xf32, #tpu.memory_space<vmem>>, vector<96x16xf32>
    %cst = arith.constant dense<0.000000e+00> : vector<96x896xf32>
    %15 = tpu.matmul %14, %13, %cst {dimension_numbers = #tpu.dot_dimension_numbers<[1], [0], [0], [1], [0, 0, 1, 1], [], []>} : vector<96x16xf32>, vector<16x896xf32>, vector<96x896xf32> -> vector<96x896xf32>
    %c0_7 = arith.constant 0 : index
    %c0_8 = arith.constant 0 : index
    %16 = vector.load %arg5[%c0_7, %c0_8] : memref<96x1xf32, #tpu.memory_space<vmem>>, vector<96x1xf32>
    %17 = vector.broadcast %16 : vector<96x1xf32> to vector<96x896xf32>
    %18 = arith.addf %15, %17 : vector<96x896xf32>
    %cst_9 = arith.constant 0.000000e+00 : f32
    %19 = vector.broadcast %cst_9 : f32 to vector<96x896xf32>
    %20 = arith.maximumf %18, %19 : vector<96x896xf32>
    %21 = vector.extract_strided_slice %20 {offsets = [0, 0], sizes = [32, 896], strides = [1, 1]} : vector<96x896xf32> to vector<32x896xf32>
    %c0_10 = arith.constant 0 : index
    %c0_11 = arith.constant 0 : index
    %c0_12 = arith.constant 0 : index
    %22 = vector.load %arg6[%c0_10, %c0_11, %c0_12] : memref<1x32x896xf32, #tpu.memory_space<vmem>>, vector<1x32x896xf32>
    %23 = vector.shape_cast %22 : vector<1x32x896xf32> to vector<32x896xf32>
    %24 = vector.shape_cast %21 : vector<32x896xf32> to vector<1x32x896xf32>
    tpu.vector_store %arg6[%c0_10, %c0_11, %c0_12], %24 {strides = array<i32>} : memref<1x32x896xf32, #tpu.memory_space<vmem>>, vector<1x32x896xf32>,
    %25 = vector.extract_strided_slice %20 {offsets = [32, 0], sizes = [32, 896], strides = [1, 1]} : vector<96x896xf32> to vector<32x896xf32>
    %c0_13 = arith.constant 0 : index
    %c0_14 = arith.constant 0 : index
    %c0_15 = arith.constant 0 : index
    %26 = vector.load %arg7[%c0_13, %c0_14, %c0_15] : memref<1x32x896xf32, #tpu.memory_space<vmem>>, vector<1x32x896xf32>
    %27 = vector.shape_cast %26 : vector<1x32x896xf32> to vector<32x896xf32>
    %28 = vector.shape_cast %25 : vector<32x896xf32> to vector<1x32x896xf32>
    tpu.vector_store %arg7[%c0_13, %c0_14, %c0_15], %28 {strides = array<i32>} : memref<1x32x896xf32, #tpu.memory_space<vmem>>, vector<1x32x896xf32>,
    %29 = vector.extract_strided_slice %20 {offsets = [64, 0], sizes = [32, 896], strides = [1, 1]} : vector<96x896xf32> to vector<32x896xf32>
    %c0_16 = arith.constant 0 : index
    %c0_17 = arith.constant 0 : index
    %c0_18 = arith.constant 0 : index
    %30 = vector.load %arg8[%c0_16, %c0_17, %c0_18] : memref<1x32x896xf32, #tpu.memory_space<vmem>>, vector<1x32x896xf32>
    %31 = vector.shape_cast %30 : vector<1x32x896xf32> to vector<32x896xf32>
    %32 = vector.shape_cast %29 : vector<32x896xf32> to vector<1x32x896xf32>
    tpu.vector_store %arg8[%c0_16, %c0_17, %c0_18], %32 {strides = array<i32>} : memref<1x32x896xf32, #tpu.memory_space<vmem>>, vector<1x32x896xf32>,
    return
  }
  func.func @transform_0(%arg0: i32, %arg1: i32) -> (i32, i32, i32) {
    %c0_i32 = arith.constant 0 : i32
    %c0_i32_0 = arith.constant 0 : i32
    return %arg0, %c0_i32, %arg1 : i32, i32, i32
  }
  func.func @transform_1(%arg0: i32, %arg1: i32) -> (i32, i32, i32) {
    %c1_i32 = arith.constant 1 : i32
    %0 = arith.addi %arg1, %c1_i32 : i32
    %c7_i32 = arith.constant 7 : i32
    %1 = arith.muli %0, %c7_i32 : i32
    %c0_i32 = arith.constant 0 : i32
    %c0_i32_0 = arith.constant 0 : i32
    return %arg0, %c0_i32, %1 : i32, i32, i32
  }
  func.func @transform_2(%arg0: i32, %arg1: i32) -> (i32, i32) {
    %c0_i32 = arith.constant 0 : i32
    %c0_i32_0 = arith.constant 0 : i32
    %c0_i32_1 = arith.constant 0 : i32
    return %c0_i32, %c0_i32_0 : i32, i32
  }
  func.func @transform_3(%arg0: i32, %arg1: i32) -> (i32, i32) {
    %c0_i32 = arith.constant 0 : i32
    %c0_i32_0 = arith.constant 0 : i32
    %c0_i32_1 = arith.constant 0 : i32
    return %c0_i32, %c0_i32_0 : i32, i32
  }
  func.func @transform_4(%arg0: i32, %arg1: i32) -> (i32, i32, i32) {
    %c0_i32 = arith.constant 0 : i32
    %c0_i32_0 = arith.constant 0 : i32
    return %arg0, %c0_i32, %arg1 : i32, i32, i32
  }
  func.func @transform_5(%arg0: i32, %arg1: i32) -> (i32, i32, i32) {
    %c0_i32 = arith.constant 0 : i32
    %c0_i32_0 = arith.constant 0 : i32
    return %arg0, %c0_i32, %arg1 : i32, i32, i32
  }
  func.func @transform_6(%arg0: i32, %arg1: i32) -> (i32, i32, i32) {
    %c0_i32 = arith.constant 0 : i32
    %c0_i32_0 = arith.constant 0 : i32
    return %arg0, %c0_i32, %arg1 : i32, i32, i32
  }
}

</mosaic_0001>

<bundles_post_ra>
// kernel: a_call__.1
= control target key start
LH: loop header
LB: loop body
LE: loop exit
PB: predicated region body
PF: predicated region fallthrough
CT: control target
= control target key end

     0   :  { %s3207_s0 = inlined_call_operand.vmem [shape: f32[2,2,1920], index: 0, kind: input, shape index: {}, may-alias: {0,1}]   ;;  %s3208_s1 = inlined_call_operand.vmem [shape: f32[2,2,1920], index: 1, kind: input, shape index: {}, may-alias: {0,1}]   ;;  %s3209_s2 = inlined_call_operand.vmem [shape: f32[96,16], index: 2, kind: input, shape index: {}]   ;;  %s3210_s3 = inlined_call_operand.vmem [shape: f32[96,1], index: 3, kind: input, shape index: {}]   ;;  %s3211_s4 = inlined_call_operand.hbm [shape: f32[2,32,1023], index: 4, kind: output, shape index: {0}]   ;;  %s3212_s5 = inlined_call_operand.hbm [shape: f32[2,32,1023], index: 5, kind: output, shape index: {1}]   ;;  %s3213_s6 = inlined_call_operand.hbm [shape: f32[2,32,1023], index: 6, kind: output, shape index: {2}]  }
   0x1   :  { %3226 = sst [smem:[#allocation11_spill]] %s3207_s0 }
   0x2   :  { %3227 = sst [smem:[#allocation12_spill]] %s3208_s1 }
   0x3   :  { %3228 = sst [smem:[#allocation13_spill]] %s3209_s2 }
   0x4   :  { %3229 = sst [smem:[#allocation14_spill]] %s3210_s3 }
   0x5   :  { %12 = vsyncpa [#allocation3], 0 }
   0x6   :  { %14 = vsyncpa [#allocation3 + $0x1], 0 }
   0x7   :  { %15 = vsyncpa [#allocation5], 0 }
   0x8   :  { %17 = vsyncpa [#allocation5 + $0x1], 0  ;;  %s2217_s21 = smov 0   ;;  %s2219_s22 = smov 0  }
   0x9   :  { %s2221_s23 = smov 0   ;;  %s2223_s24 = smov 0  }
   0xa   :  { %s2225_s25 = smov 0   ;;  %s2227_s26 = smov 0  }
   0xb   :  { %s2229_s27 = smov 0   ;;  %s2231_s28 = smov 0  }
   0xc LB: > { %s3215_s29 = sadd.s32 4294967295, %s2161_s28   ;;  %s3214_s30 = sadd.s32 4294967294, %s2161_s28   ;;  %s2161_s28 = sphi %s2231_s28, %s23_s28   ;;  %s2157_s27 = sphi %s2229_s27, %s3254_s27   ;;  %s2153_s26 = sphi %s2227_s26, %s3253_s26   ;;  %s2149_s25 = sphi %s2225_s25, %s3252_s25   ;;  %s2145_s24 = sphi %s2223_s24, %s3251_s24   ;;  %s2141_s23 = sphi %s2221_s23, %s3250_s23   ;;  %s2137_s22 = sphi %s2219_s22, %s3249_s22   ;;  %s2133_s21 = sphi %s2217_s21, %s3248_s21  }
   0xd   : > { %s32_s7 = sadd.s32 1, %s2153_s26  ;;  %s35_s8 = sadd.s32 1, %s2157_s27 }
   0xe   : > { %p33_p0 = scmp.ge.s32.totalorder %s32_s7, 2  ;;  %p156_p1 = scmp.ne.s32.totalorder %s2141_s23, %s2137_s22 }
   0xf   : > { %p157_p2 = scmp.eq.s32.totalorder %s3215_s29, 3  ;;  %p162_p5 = scmp.ne.s32.totalorder %s2137_s22, %s2133_s21 }
  0x10   : > { %s3256_s7 = smov (%p33_p0, %s32_s7), 0  ;;  %s3258_s8 = smov (!%p33_p0, %s35_s8), %s2157_s27 }
  0x11   : > { %3230 = sst [smem:[#allocation9_spill]] %s3256_s7  ;;  %s142_s9 = ssub.s32 %s2153_s26, %s3256_s7 }
  0x12   : > { %p2270_p3 = por %p157_p2, %p156_p1  ;;  %p37_p4 = scmp.ge.s32.totalorder %s3258_s8, 2 }
  0x13   : > { %p163_p6 = scmp.eq.s32.totalorder %s3214_s30, 3  ;;  %p1793_p7 = scmp.ge.s32.totalorder %s2161_s28, 1 }
  0x14   : > { %s3260_s8 = smov (%p37_p4, %s3258_s8), 0  ;;  %p279_p9 = scmp.lt.s32.totalorder %s2161_s28, 5 }
  0x15   : > { %3232 = sst [smem:[#allocation10_spill]] %s3260_s8  ;;  %p2281_p8 = por %p163_p6, %p162_p5 }
  0x16   : > { %s141_s12 = ssub.s32 %s2157_s27, %s3260_s8  ;;  %s146_s13 = sadd.s32 1, %s2141_s23 }
  0x17   : > { %s143_s14 = sor.u32 %s142_s9, %s141_s12  ;;  %p280_p10 = pnand %p1793_p7, %p279_p9 }
  0x18   : > { %p144_p11 = scmp.eq.s32.totalorder %s143_s14, 0  ;;  %s2293_s16 = smul.u32 (!%p280_p10), 7, %s2145_s24 }
  0x19   : > { %283 = sbr.rel (%p280_p10) target bundleno = 596 (0x254), region = 36  ;;  %p342_p12 = scmp.lt.s32.totalorder (!%p280_p10), %s2149_s25, 1 }
  0x1a   : > { %s2290_s15 = scalar_select %p144_p11, %s2141_s23, %s146_s13  }
  0x1b   : > { %p344_p13 = scmp.lt.s32.totalorder (!%p280_p10), %s2293_s16, 14  ;;  %s3234_s0 = sld [smem:[#allocation11_spill]] (!%p280_p10) }
  0x1c   : > { %s3220_s30 = smov (!%p280_p10), 124   ;;  %s2168_s12 = smov (!%p280_p10), 121  }
  0x1d   : > { %s3216_s13 = smov (!%p280_p10), 126   ;;  %s3221_s29 = smov (!%p280_p10), 125  }
  0x1e   : > { %v391_v0 = vlaneseq  ;;  %v2163_v1 = vmov 1983009808   ;;  %s2297_s17 = scalar_select %p342_p12, %s2149_s25, 1  ;;  %v2171_v24 = vmov 0.0   ;;  %v2172_v40 = vmov 0  }
  0x1f   : > { %v389_v2 = vunpack.c.l.s4 %v2163_v1  ;;  %s345_s19 = scalar_select %p344_p13, %s2293_s16, 14  ;;  %953 = vmatprep.mubr.f32.mxu1 %v2171_v24  ;;  %899 = vmatprep.mubr.f32.mxu0 %v2171_v24  ;;  %vm623_vm0 = vcmask 998400   ;;  %vm592_vm1 = vcmask 1006592   ;;  %vm561_vm2 = vcmask 1014784  }
  0x20   : > { %v392_v4 = vshrl.u32 %v391_v0, 7  ;;  %s1914_s18 = smul.u32 15, %s2297_s17  ;;  %s3236_s1 = sld [smem:[#allocation12_spill]]  ;;  %2010 = vset.pattern.permute.xlu1 %v2172_v40  ;;  %2009 = vset.pattern.permute.xlu0 %v2172_v40  ;;  %vm654_vm3 = vcmask 990208   ;;  %vm677_vm4 = vcmask 1043456   ;;  %vm669_vm5 = vcmask 1041408  }
  0x21   : > { %v390_v3 = vunpack.c.0.s8 %v389_v2  ;;  %s3238_s17 = smov 124   ;;  %s3242_s3 = sld [smem:[#allocation14_spill]]  ;;  %vm685_vm6 = vcmask 1045504   ;;  %vm452_vm7 = vcmask 1039360   ;;  %vm491_vm8 = vcmask 1031168  }
  0x22   : > { %s347_s20 = sadd.s32 %s1914_s18, %s345_s19  ;;  %s3218_s19 = smov 123   ;;  %vm530_vm9 = vcmask 1022976   ;;  %vm798_vm10 = vcmask 130048  }
  0x23   : > { %v2304_v5 = vsub.s32 %v390_v3, %v392_v4  ;;  %s1794_s9 = sshll.u32 %s347_s20, 1  ;;  %s3219_s20 = smov 122  }
  0x24   : > { %s2309_s14 = scalar_lea.vmem %s3234_s0, %s1794_s9  ;;  %s3223_s9 = smov 127  }
  0x25   : > { %v382_v6 = vld [vmem:[%s2309_s14] sm:$0xff]  ;;  %v383_v19 = vld [vmem:[%s2309_s14 + $0x8] sm:$0x3f]  ;;  %s355_s14 = sadd.s32 1, %s2145_s24  ;;  %s3243_s2 = sld [smem:[#allocation13_spill]] }
  0x26   : > { %v2313_v7 = vrot.slane %v382_v6, %v2304_v5  ;;  %v387_v8 = vcombine.high %v382_v6, %v382_v6  ;;  %v2362_v21 = vrot.slane %v383_v19, %v2304_v5  ;;  %v404_v28 = vcombine.high %v383_v19, %v383_v19 }
  0x27   : > { %v726_v41 = vld [vmem:[%s3242_s3] sm:$0xff]  ;;  %v727_v42 = vld [vmem:[%s3242_s3 + $0x8] sm:$0xff]  ;;  %v729_v43 = vld [vmem:[%s3242_s3 + $0x18] sm:$0xff] }
  0x28   : > { %545 = vrot.lane.b32.xlu0 %v2313_v7, %s3220_s30  ;;  %v428_v9 = vrot.slane %v2313_v7, 6  ;;  %v2320_v10 = vcombine.high %v2313_v7, %v2313_v7  ;;  %v2325_v12 = vrot.slane %v387_v8, %v2304_v5  ;;  %v467_v15 = vrot.slane %v2313_v7, 4  ;;  %v728_v45 = vld [vmem:[%s3242_s3 + $0x10] sm:$0xff]  ;;  %v731_v47 = vld [vmem:[%s3242_s3 + $0x28] sm:$0xff]  ;;  %v730_v49 = vld [vmem:[%s3242_s3 + $0x20] sm:$0xff] }
  0x29   : > { %v506_v18 = vrot.slane %v2313_v7, 2  ;;  %v432_v23 = vrot.slane %v2362_v21, 6  ;;  %v471_v25 = vrot.slane %v2362_v21, 4  ;;  %v510_v27 = vrot.slane %v2362_v21, 2  ;;  %v733_v51 = vld [vmem:[%s3242_s3 + $0x38] sm:$0xff]  ;;  %v732_v53 = vld [vmem:[%s3242_s3 + $0x30] sm:$0xff] }
  0x2a   : > { %576 = vrot.lane.b32.xlu1 %v428_v9, %s3218_s19  ;;  %v429_v11 = vrot.slane %v2320_v10, 6  ;;  %v430_v13 = vrot.slane %v2325_v12, 6  ;;  %v469_v14 = vrot.slane %v2325_v12, 4  ;;  %v507_v16 = vrot.slane %v2320_v10, 2  ;;  %v735_v55 = vld [vmem:[%s3242_s3 + $0x48] sm:$0xff]  ;;  %v734_v57 = vld [vmem:[%s3242_s3 + $0x40] sm:$0xff] }
  0x2b   : > { %v508_v17 = vrot.slane %v2325_v12, 2  ;;  %v2358_v20 = vcombine.high %v2325_v12, %v2325_v12  ;;  %v2390_v29 = vcombine.high %v2362_v21, %v2362_v21  ;;  %v2394_v30 = vrot.slane %v404_v28, %v2304_v5  ;;  %v737_v59 = vld [vmem:[%s3242_s3 + $0x58] sm:$0xff]  ;;  %v736_v61 = vld [vmem:[%s3242_s3 + $0x50] sm:$0xff] }
  0x2c   : > { %547 = vrot.lane.b32.xlu0 %v2320_v10, %s3220_s30 }
  0x2d   : > { %v431_v22 = vrot.slane %v2358_v20, 6  ;;  %v509_v26 = vrot.slane %v2358_v20, 2  ;;  %v433_v31 = vrot.slane %v2390_v29, 6  ;;  %v434_v32 = vrot.slane %v2394_v30, 6 }
  0x2e   : > { %578 = vrot.lane.b32.xlu1 %v429_v11, %s3218_s19  ;;  %v473_v33 = vrot.slane %v2394_v30, 4  ;;  %v511_v34 = vrot.slane %v2390_v29, 2  ;;  %v512_v35 = vrot.slane %v2394_v30, 2 }
  0x30   : > { %549 = vrot.lane.b32.xlu0 %v2325_v12, %s3220_s30 }
  0x32   : > { %580 = vrot.lane.b32.xlu1 %v430_v13, %s3218_s19 }
  0x34   : > { %609 = vrot.lane.b32.xlu0 %v2320_v10, %s3219_s20 }
  0x36   : > { %611 = vrot.lane.b32.xlu1 %v469_v14, %s3219_s20 }
  0x38   : > { %438 = vrot.lane.b32.xlu0 %v429_v11, %s3223_s9 }
  0x3a   : > { %440 = vrot.lane.b32.xlu1 %v430_v13, %s3223_s9 }
  0x3c   : > { %607 = vrot.lane.b32.xlu0 %v467_v15, %s3219_s20 }
  0x3e   : > { %640 = vrot.lane.b32.xlu1 %v507_v16, %s2168_s12 }
  0x40   : > { %642 = vrot.lane.b32.xlu0 %v508_v17, %s2168_s12 }
  0x42   : > { %436 = vrot.lane.b32.xlu1 %v428_v9, %s3223_s9 }
  0x44   : > { %477 = vrot.lane.b32.xlu0 %v2320_v10, %s3216_s13 }
  0x46   : > { %479 = vrot.lane.b32.xlu1 %v469_v14, %s3216_s13 }
  0x48   : > { %638 = vrot.lane.b32.xlu0 %v506_v18, %s2168_s12 }
  0x4a   : > { %475 = vrot.lane.b32.xlu1 %v467_v15, %s3216_s13 }
  0x4c   : > { %516 = vrot.lane.b32.xlu0 %v507_v16, %s3221_s29 }
  0x4e   : > { %518 = vrot.lane.b32.xlu1 %v508_v17, %s3221_s29 }
  0x50   : > { %514 = vrot.lane.b32.xlu0 %v506_v18, %s3221_s29 }
  0x52   : > { %551 = vrot.lane.b32.xlu1 %v2358_v20, %s3220_s30 }
  0x54   : > { %553 = vrot.lane.b32.xlu0 %v2362_v21, %s3220_s30 }
  0x56   : > { %582 = vrot.lane.b32.xlu1 %v431_v22, %s3218_s19 }
  0x58   : > { %584 = vrot.lane.b32.xlu0 %v432_v23, %s3218_s19 }
  0x5a   : > { %613 = vrot.lane.b32.xlu1 %v2358_v20, %s3219_s20 }
  0x5c   : > { %615 = vrot.lane.b32.xlu0 %v471_v25, %s3219_s20 }
  0x5e   : > { %442 = vrot.lane.b32.xlu1 %v431_v22, %s3223_s9 }
  0x60   : > { %444 = vrot.lane.b32.xlu0 %v432_v23, %s3223_s9 }
  0x62   : > { %644 = vrot.lane.b32.xlu1 %v509_v26, %s2168_s12 }
  0x64   : > { %646 = vrot.lane.b32.xlu0 %v510_v27, %s2168_s12 }
  0x66   : > { %481 = vrot.lane.b32.xlu1 %v2358_v20, %s3216_s13 }
  0x68   : > { %483 = vrot.lane.b32.xlu0 %v471_v25, %s3216_s13  ;;  %s356_s13 = smul.u32 7, %s355_s14 }
  0x6a   : > { %520 = vrot.lane.b32.xlu1 %v509_v26, %s3221_s29  ;;  %p359_p0 = scmp.lt.s32.totalorder %s356_s13, 14 }
  0x6c   : > { %522 = vrot.lane.b32.xlu0 %v510_v27, %s3221_s29  ;;  %s3262_s13 = smov (!%p359_p0, %s356_s13), 14 }
  0x6d   : > { %s362_s24 = sadd.s32 %s1914_s18, %s3262_s13  ;;  %s3239_s18 = smov 123  }
  0x6e   : > { %555 = vrot.lane.b32.xlu1 %v2390_v29, %s3220_s30  ;;  %s1795_s14 = sshll.u32 %s362_s24, 1  ;;  %s3240_s13 = smov 122  }
  0x6f   : > { %s364_s29 = scalar_lea.vmem %s3236_s1, %s1795_s14  ;;  %s3241_s24 = smov 127  }
  0x70   : > { %557 = vrot.lane.b32.xlu0 %v2394_v30, %s3220_s30  ;;  %v384_v36 = vld [vmem:[%s364_s29] sm:$0x3] }
  0x71   : > { %v435_v37 = vrot.slane %v384_v36, 6  ;;  %v474_v38 = vrot.slane %v384_v36, 4  ;;  %v513_v39 = vrot.slane %v384_v36, 2 }
  0x72   : > { %586 = vrot.lane.b32.xlu1 %v433_v31, %s3218_s19 }
  0x74   : > { %588 = vrot.lane.b32.xlu0 %v434_v32, %s3218_s19  ;;  %s3235_s19 = smov 126  }
  0x76   : > { %617 = vrot.lane.b32.xlu1 %v2390_v29, %s3219_s20 }
  0x78   : > { %619 = vrot.lane.b32.xlu0 %v473_v33, %s3219_s20  ;;  %s1558_s20 = ssub.s32 (%p2270_p3), 8, %s2293_s16 }
  0x79   : > { %p1559_p1 = scmp.lt.s32.totalorder (%p2270_p3), %s1558_s20, 7 }
  0x7a   : > { %446 = vrot.lane.b32.xlu1 %v433_v31, %s3223_s9 }
  0x7c   : > { %448 = vrot.lane.b32.xlu0 %v434_v32, %s3223_s9  ;;  %s3237_s9 = smov 125  }
  0x7e   : > { %648 = vrot.lane.b32.xlu1 %v511_v34, %s2168_s12 }
  0x80   : > { %650 = vrot.lane.b32.xlu0 %v512_v35, %s2168_s12 }
  0x82   : > { %485 = vrot.lane.b32.xlu1 %v2390_v29, %s3235_s19 }
  0x84   : > { %487 = vrot.lane.b32.xlu0 %v473_v33, %s3235_s19 }
  0x86   : > { %524 = vrot.lane.b32.xlu1 %v511_v34, %s3237_s9 }
  0x88   : > { %526 = vrot.lane.b32.xlu0 %v512_v35, %s3237_s9 }
  0x8a   : > { %559 = vrot.lane.b32.xlu1 %v384_v36, %s3238_s17  ;;  %s320_s17 = sand.u32 1, %s2137_s22  }
  0x8b   : > { %s3028_s29 = scalar_lea.sflag [#allocation3], %s320_s17 }
  0x8c   : > { %590 = vrot.lane.b32.xlu0 %v435_v37, %s3239_s18  ;;  %s3244_s18 = sadd.s32 4294967295, %s2161_s28  }
  0x8e   : > { %621 = vrot.lane.b32.xlu1 %v474_v38, %s3240_s13  ;;  %s2841_s13 = smul.u32 224, %s320_s17 }
  0x90   : > { %450 = vrot.lane.b32.xlu0 %v435_v37, %s3241_s24  ;;  %s2857_s24 = scalar_lea.vmem [#allocation6], %s2841_s13 }
  0x92   : > { %652 = vrot.lane.b32.xlu1 %v513_v39, %s2168_s12  ;;  %s2827_s12 = sand.u32 1, %s3244_s18  }
  0x93   : > { %s3031_s30 = scalar_lea.sflag [#allocation5], %s2827_s12 }
  0x94   : > { %489 = vrot.lane.b32.xlu0 %v474_v38, %s3235_s19  ;;  %s2852_s19 = scalar_lea.vmem [#allocation2], %s2841_s13 }
  0x96   : > { %528 = vrot.lane.b32.xlu1 %v513_v39, %s3237_s9  ;;  %s2886_s9 = scalar_lea.vmem [#allocation4], %s2841_s13 }
  0x98   : > { %740 = vperm.xlu0 %2009, %v726_v41  }
  0x9a   : > { %v546_v44 = vpop.permute.xlu0 %545  ;;  %745 = vperm.xlu1 %2010, %v727_v42   ;;  %v2519_v42 = vld [vmem:[%s3243_s2 + $0x48] sm:$0xff] }
  0x9c   : > { %v577_v46 = vpop.permute.xlu1 %576  ;;  %755 = vperm.xlu0 %2009, %v729_v43   ;;  %v2524_v43 = vld [vmem:[%s3243_s2] sm:$0xff] }
  0x9e   : > { %v548_v48 = vpop.permute.xlu0 %547  ;;  %750 = vperm.xlu1 %2010, %v728_v45  }
  0x9f   : > { %v562_v17 = vsel %vm561_vm2, %v546_v44, %v548_v48 }
  0xa0   : > { %v579_v50 = vpop.permute.xlu1 %578  ;;  %765 = vperm.xlu0 %2009, %v731_v47   ;;  %v2543_v47 = vld [vmem:[%s3243_s2 + $0x50] sm:$0xff] }
  0xa1   : > { %v593_v14 = vsel %vm592_vm1, %v577_v46, %v579_v50  ;;  %v2538_v46 = vld [vmem:[%s3243_s2 + $0x8] sm:$0xff] }
  0xa2   : > { %v2453_v52 = vpop.permute.xlu0 %549  ;;  %760 = vperm.xlu1 %2010, %v730_v49   ;;  %v693_v18 = vsel %vm669_vm5, %v562_v17, %v593_v14 }
  0xa3   : > { %v563_v3 = vsel %vm561_vm2, %v548_v48, %v2453_v52 }
  0xa4   : > { %v2458_v54 = vpop.permute.xlu1 %580  ;;  %775 = vperm.xlu0 %2009, %v733_v51   ;;  %v2561_v51 = vld [vmem:[%s3243_s2 + $0x58] sm:$0xff] }
  0xa5   : > { %v594_v0 = vsel %vm592_vm1, %v579_v50, %v2458_v54  ;;  %v2556_v50 = vld [vmem:[%s3243_s2 + $0x10] sm:$0xff] }
  0xa6   : > { %v610_v56 = vpop.permute.xlu0 %609  ;;  %770 = vperm.xlu1 %2010, %v732_v53   ;;  %v694_v4 = vsel %vm669_vm5, %v563_v3, %v594_v0 }
  0xa8   : > { %v2466_v58 = vpop.permute.xlu1 %611  ;;  %785 = vperm.xlu0 %2009, %v735_v55  }
  0xa9   : > { %v625_v1 = vsel %vm623_vm0, %v610_v56, %v2466_v58 }
  0xaa   : > { %v439_v60 = vpop.permute.xlu0 %438  ;;  %780 = vperm.xlu1 %2010, %v734_v57   ;;  %v701_v8 = vsel %vm677_vm4, %v694_v4, %v625_v1 }
  0xac   : > { %v2474_v62 = vpop.permute.xlu1 %440  ;;  %795 = vperm.xlu0 %2009, %v737_v59  }
  0xad   : > { %v454_v27 = vsel %vm452_vm7, %v439_v60, %v2474_v62 }
  0xae   : > { %v608_v63 = vpop.permute.xlu0 %607  ;;  %790 = vperm.xlu1 %2010, %v736_v61   ;;  %v671_v33 = vsel %vm669_vm5, %v2320_v10, %v454_v27  ;;  %v2586_v61 = vld [vmem:[%s3243_s2 + $0x20] sm:$0xff] }
  0xaf   : > { %v624_v15 = vsel %vm623_vm0, %v608_v63, %v610_v56  ;;  %v2574_v56 = vld [vmem:[%s3243_s2 + $0x18] sm:$0xff] }
  0xb0   : > { %v641_v2 = vpop.permute.xlu1 %640  ;;  %v700_v23 = vsel %vm677_vm4, %v693_v18, %v624_v15 }
  0xb2   : > { %v2483_v5 = vpop.permute.xlu0 %642 }
  0xb3   : > { %v656_v6 = vsel %vm654_vm3, %v641_v2, %v2483_v5 }
  0xb4   : > { %v437_v9 = vpop.permute.xlu1 %436  ;;  %v708_v11 = vsel %vm685_vm6, %v701_v8, %v656_v6 }
  0xb5   : > { %863 = vmatprep.subr.mxu0 %v708_v11  ;;  %1909 = vmatprep.subr.mxu1 %v708_v11  ;;  %v453_v32 = vsel %vm452_vm7, %v437_v9, %v439_v60 }
  0xb6   : > { %v478_v13 = vpop.permute.xlu0 %477  ;;  %v670_v38 = vsel %vm669_vm5, %v2313_v7, %v453_v32 }
  0xb8   : > { %v2491_v16 = vpop.permute.xlu1 %479 }
  0xb9   : > { %v493_v28 = vsel %vm491_vm8, %v478_v13, %v2491_v16 }
  0xba   : > { %v639_v19 = vpop.permute.xlu0 %638  ;;  %v679_v37 = vsel %vm677_vm4, %v671_v33, %v493_v28 }
  0xbb   : > { %v655_v22 = vsel %vm654_vm3, %v639_v19, %v641_v2  ;;  %v2628_v19 = vld [vmem:[%s3243_s2 + $0x30] sm:$0xff] }
  0xbc   : > { %v476_v25 = vpop.permute.xlu1 %475  ;;  %v707_v26 = vsel %vm685_vm6, %v700_v23, %v655_v22 }
  0xbd   : > { %864 = vmatpush1.msra.mxu0 %v707_v26  ;;  %1911 = vmatpush1.msra.mxu1 %v707_v26  ;;  %v492_v34 = vsel %vm491_vm8, %v476_v25, %v478_v13 }
  0xbe   : > { %v517_v31 = vpop.permute.xlu0 %516  ;;  %v678_v10 = vsel %vm677_vm4, %v670_v38, %v492_v34 }
  0xc0   : > { %v2506_v35 = vpop.permute.xlu1 %518 }
  0xc1   : > { %v532_v36 = vsel %vm530_vm9, %v517_v31, %v2506_v35 }
  0xc2   : > { %v515_v39 = vpop.permute.xlu0 %514  ;;  %v687_v40 = vsel %vm685_vm6, %v679_v37, %v532_v36  ;;  %v2668_v37 = vld [vmem:[%s3243_s2 + $0x40] sm:$0xff] }
  0xc3   : > { %v531_v41 = vsel %vm530_vm9, %v515_v39, %v517_v31  ;;  %865 = vmatprep.subr.mxu0 %v687_v40  ;;  %1910 = vmatprep.subr.mxu1 %v687_v40 }
  0xc4   : > { %v552_v7 = vpop.permute.xlu1 %551  ;;  %v686_v44 = vsel %vm685_vm6, %v678_v10, %v531_v41 }
  0xc5   : > { %866 = vmatpush1.msra.mxu0 %v686_v44  ;;  %1912 = vmatpush1.msra.mxu1 %v686_v44  ;;  %v564_v4 = vsel %vm561_vm2, %v2453_v52, %v552_v7  ;;  %v2613_v52 = vld [vmem:[%s3243_s2 + $0x28] sm:$0xff] }
  0xc6   : > { %v2527_v45 = vpop.permute.xlu0 %553  ;;  %1805 = vmatmul.mubr.msk.f32.vlgmr.msra.gmra.mxu1 %vm798_vm10, %v2519_v42  ;;  %1796 = vmatmul.mubr.msk.f32.vlgmr.msra.gmra.mxu0 %vm798_vm10, %v2524_v43 }
  0xc7   : > { %905 = vmatprep.mubr.f32.mxu0 %v2171_v24  ;;  %959 = vmatprep.mubr.f32.mxu1 %v2171_v24  ;;  %v565_v2 = vsel %vm561_vm2, %v552_v7, %v2527_v45 }
  0xc8   : > { %v583_v48 = vpop.permute.xlu1 %582 }
  0xc9   : > { %v595_v63 = vsel %vm592_vm1, %v2458_v54, %v583_v48 }
  0xca   : > { %v2545_v49 = vpop.permute.xlu0 %584  ;;  %1797 = vmatmul.mubr.msk.f32.gmra.mxu0 %vm798_vm10, %v2538_v46  ;;  %1806 = vmatmul.mubr.msk.f32.gmra.mxu1 %vm798_vm10, %v2543_v47  ;;  %v695_v54 = vsel %vm669_vm5, %v564_v4, %v595_v63 }
  0xcb   : > { %911 = vmatprep.mubr.f32.mxu0 %v2171_v24  ;;  %965 = vmatprep.mubr.f32.mxu1 %v2171_v24  ;;  %v596_v60 = vsel %vm592_vm1, %v583_v48, %v2545_v49 }
  0xcc   : > { %v614_v53 = vpop.permute.xlu1 %613  ;;  %v696_v6 = vsel %vm669_vm5, %v565_v2, %v596_v60 }
  0xcd   : > { %v626_v3 = vsel %vm623_vm0, %v2466_v58, %v614_v53 }
  0xce   : > { %v2563_v55 = vpop.permute.xlu0 %615  ;;  %1798 = vmatmul.mubr.msk.f32.gmra.mxu0 %vm798_vm10, %v2556_v50  ;;  %1807 = vmatmul.mubr.msk.f32.gmra.mxu1 %vm798_vm10, %v2561_v51 }
  0xcf   : > { %917 = vmatprep.mubr.f32.mxu0 %v2171_v24  ;;  %1036 = vmatprep.mubr.f32.mxu1 %v2171_v24  ;;  %v627_v0 = vsel %vm623_vm0, %v614_v53, %v2563_v55 }
  0xd0   : > { %v443_v57 = vpop.permute.xlu1 %442  ;;  %v703_v58 = vsel %vm677_vm4, %v696_v6, %v627_v0 }
  0xd1   : > { %v455_v22 = vsel %vm452_vm7, %v2474_v62, %v443_v57 }
  0xd2   : > { %v2576_v59 = vpop.permute.xlu0 %444  ;;  %1799 = vmatmul.mubr.msk.f32.gmra.mxu0 %vm798_vm10, %v2574_v56  ;;  %v672_v62 = vsel %vm669_vm5, %v2325_v12, %v455_v22 }
  0xd3   : > { %923 = vmatprep.mubr.f32.mxu0 %v2171_v24  ;;  %v456_v18 = vsel %vm452_vm7, %v443_v57, %v2576_v59 }
  0xd4   : > { %v645_v1 = vpop.permute.xlu1 %644  ;;  %v673_v27 = vsel %vm669_vm5, %v2358_v20, %v456_v18  ;;  %v2653_v20 = vld [vmem:[%s3243_s2 + $0x38] sm:$0xff] }
  0xd5   : > { %v657_v8 = vsel %vm654_vm3, %v2483_v5, %v645_v1  ;;  %v702_v5 = vsel %vm677_vm4, %v695_v54, %v626_v3 }
  0xd6   : > { %v2601_v9 = vpop.permute.xlu0 %646  ;;  %1800 = vmatmul.mubr.msk.f32.gmra.mxu0 %vm798_vm10, %v2586_v61  ;;  %v709_v15 = vsel %vm685_vm6, %v702_v5, %v657_v8 }
  0xd7   : > { %v658_v11 = vsel %vm654_vm3, %v645_v1, %v2601_v9  ;;  %929 = vmatprep.mubr.f32.mxu0 %v2171_v24 }
  0xd8   : > { %v482_v13 = vpop.permute.xlu1 %481  ;;  %v710_v14 = vsel %vm685_vm6, %v703_v58, %v658_v11 }
  0xd9   : > { %1000 = vmatprep.subr.mxu1 %v710_v14  ;;  %v494_v26 = vsel %vm491_vm8, %v2491_v16, %v482_v13 }
  0xda   : > { %v2618_v17 = vpop.permute.xlu0 %483  ;;  %1001 = vmatpush1.msra.mxu1 %v709_v15  ;;  %1801 = vmatmul.mubr.msk.f32.gmra.mxu0 %vm798_vm10, %v2613_v52  ;;  %v680_v16 = vsel %vm677_vm4, %v672_v62, %v494_v26 }
  0xdb   : > { %935 = vmatprep.mubr.f32.mxu0 %v2171_v24  ;;  %v495_v23 = vsel %vm491_vm8, %v482_v13, %v2618_v17 }
  0xdc   : > { %v521_v25 = vpop.permute.xlu1 %520  ;;  %v681_v33 = vsel %vm677_vm4, %v673_v27, %v495_v23 }
  0xdd   : > { %v533_v28 = vsel %vm530_vm9, %v2506_v35, %v521_v25 }
  0xde   : > { %v2640_v31 = vpop.permute.xlu0 %522  ;;  %1802 = vmatmul.mubr.msk.f32.gmra.mxu0 %vm798_vm10, %v2628_v19  ;;  %v688_v12 = vsel %vm685_vm6, %v680_v16, %v533_v28 }
  0xdf   : > { %v534_v32 = vsel %vm530_vm9, %v521_v25, %v2640_v31  ;;  %941 = vmatprep.mubr.f32.mxu0 %v2171_v24 }
  0xe0   : > { %v556_v34 = vpop.permute.xlu1 %555  ;;  %v689_v35 = vsel %vm685_vm6, %v681_v33, %v534_v32 }
  0xe1   : > { %1002 = vmatprep.subr.mxu1 %v689_v35  ;;  %v566_v0 = vsel %vm561_vm2, %v2527_v45, %v556_v34 }
  0xe2   : > { %v2658_v36 = vpop.permute.xlu0 %557  ;;  %1003 = vmatpush1.msra.mxu1 %v688_v12  ;;  %1803 = vmatmul.mubr.msk.f32.gmra.mxu0 %vm798_vm10, %v2653_v20 }
  0xe3   : > { %1808 = vmatmul.mubr.msk.f32.vlgmr.msra.gmra.mxu1 %vm798_vm10, %v2524_v43  ;;  %947 = vmatprep.mubr.f32.mxu0 %v2171_v24  ;;  %v567_v60 = vsel %vm561_vm2, %v556_v34, %v2658_v36 }
  0xe4   : > { %v587_v38 = vpop.permute.xlu1 %586  ;;  %1042 = vmatprep.mubr.f32.mxu1 %v2171_v24 }
  0xe5   : > { %v597_v48 = vsel %vm592_vm1, %v2545_v49, %v587_v38 }
  0xe6   : > { %v589_v39 = vpop.permute.xlu0 %588  ;;  %1804 = vmatmul.mubr.msk.f32.gmra.mxu0 %vm798_vm10, %v2668_v37  ;;  %v697_v3 = vsel %vm669_vm5, %v566_v0, %v597_v48 }
  0xe7   : > { %1809 = vmatmul.mubr.msk.f32.gmra.mxu1 %vm798_vm10, %v2538_v46  ;;  %1173 = vmatprep.mubr.f32.mxu0 %v2171_v24  ;;  %v598_v44 = vsel %vm592_vm1, %v587_v38, %v589_v39 }
  0xe8   : > { %v618_v40 = vpop.permute.xlu1 %617  ;;  %1048 = vmatprep.mubr.f32.mxu1 %v2171_v24  ;;  %v698_v1 = vsel %vm669_vm5, %v567_v60, %v598_v44 }
  0xe9   : > { %v628_v63 = vsel %vm623_vm0, %v2563_v55, %v618_v40 }
  0xea   : > { %v620_v41 = vpop.permute.xlu0 %619  ;;  %v704_v55 = vsel %vm677_vm4, %v697_v3, %v628_v63 }
  0xeb   : > { %1810 = vmatmul.mubr.msk.f32.gmra.mxu1 %vm798_vm10, %v2556_v50  ;;  %v629_v53 = vsel %vm623_vm0, %v618_v40, %v620_v41 }
  0xec   : > { %v447_v10 = vpop.permute.xlu1 %446  ;;  %1054 = vmatprep.mubr.f32.mxu1 %v2171_v24  ;;  %v705_v6 = vsel %vm677_vm4, %v698_v1, %v629_v53 }
  0xed   : > { %v457_v58 = vsel %vm452_vm7, %v2576_v59, %v447_v10 }
  0xee   : > { %v449_v7 = vpop.permute.xlu0 %448  ;;  %v674_v23 = vsel %vm669_vm5, %v2362_v21, %v457_v58 }
  0xef   : > { %1811 = vmatmul.mubr.msk.f32.gmra.mxu1 %vm798_vm10, %v2574_v56  ;;  %v458_v11 = vsel %vm452_vm7, %v447_v10, %v449_v7 }
  0xf0   : > { %v649_v57 = vpop.permute.xlu1 %648  ;;  %1060 = vmatprep.mubr.f32.mxu1 %v2171_v24  ;;  %v675_v15 = vsel %vm669_vm5, %v2390_v29, %v458_v11 }
  0xf1   : > { %v659_v2 = vsel %vm654_vm3, %v2601_v9, %v649_v57 }
  0xf2   : > { %v651_v49 = vpop.permute.xlu0 %650  ;;  %v711_v9 = vsel %vm685_vm6, %v704_v55, %v659_v2 }
  0xf3   : > { %v660_v4 = vsel %vm654_vm3, %v649_v57, %v651_v49  ;;  %1812 = vmatmul.mubr.msk.f32.gmra.mxu1 %vm798_vm10, %v2586_v61 }
  0xf4   : > { %v486_v8 = vpop.permute.xlu1 %485  ;;  %v712_v45 = vsel %vm685_vm6, %v705_v6, %v660_v4  ;;  %1066 = vmatprep.mubr.f32.mxu1 %v2171_v24 }
  0xf5   : > { %1137 = vmatprep.subr.mxu0 %v712_v45  ;;  %v496_v14 = vsel %vm491_vm8, %v2618_v17, %v486_v8 }
  0xf6   : > { %v488_v54 = vpop.permute.xlu0 %487  ;;  %1138 = vmatpush1.msra.mxu0 %v711_v9  ;;  %v682_v26 = vsel %vm677_vm4, %v674_v23, %v496_v14 }
  0xf7   : > { %1813 = vmatmul.mubr.msk.f32.gmra.mxu1 %vm798_vm10, %v2613_v52  ;;  %v497_v5 = vsel %vm491_vm8, %v486_v8, %v488_v54 }
  0xf8   : > { %v525_v13 = vpop.permute.xlu1 %524  ;;  %1072 = vmatprep.mubr.f32.mxu1 %v2171_v24  ;;  %v683_v25 = vsel %vm677_vm4, %v675_v15, %v497_v5 }
  0xf9   : > { %v535_v18 = vsel %vm530_vm9, %v2640_v31, %v525_v13 }
  0xfa   : > { %v527_v22 = vpop.permute.xlu0 %526  ;;  %v690_v29 = vsel %vm685_vm6, %v682_v26, %v535_v18 }
  0xfb   : > { %v536_v59 = vsel %vm530_vm9, %v525_v13, %v527_v22  ;;  %1814 = vmatmul.mubr.msk.f32.gmra.mxu1 %vm798_vm10, %v2628_v19 }
  0xfc   : > { %v560_v17 = vpop.permute.xlu1 %559  ;;  %v691_v27 = vsel %vm685_vm6, %v683_v25, %v536_v59  ;;  %1078 = vmatprep.mubr.f32.mxu1 %v2171_v24 }
  0xfd   : > { %1139 = vmatprep.subr.mxu0 %v691_v27  ;;  %v568_v62 = vsel %vm561_vm2, %v2658_v36, %v560_v17 }
  0xfe   : > { %v591_v28 = vpop.permute.xlu0 %590  ;;  %1140 = vmatpush1.msra.mxu0 %v690_v29 }
  0xff   : > { %v599_v21 = vsel %vm592_vm1, %v589_v39, %v591_v28  ;;  %1820 = vmatmul.mubr.msk.f32.vlgmr.msra.gmra.mxu0 %vm798_vm10, %v2524_v43  ;;  %1815 = vmatmul.mubr.msk.f32.gmra.mxu1 %vm798_vm10, %v2653_v20 }
 0x100   : > { %v622_v31 = vpop.permute.xlu1 %621  ;;  %1179 = vmatprep.mubr.f32.mxu0 %v2171_v24  ;;  %1084 = vmatprep.mubr.f32.mxu1 %v2171_v24  ;;  %v699_v32 = vsel %vm669_vm5, %v568_v62, %v599_v21 }
 0x101   : > { %v630_v33 = vsel %vm623_vm0, %v620_v41, %v622_v31 }
 0x102   : > { %v451_v16 = vpop.permute.xlu0 %450  ;;  %v706_v36 = vsel %vm677_vm4, %v699_v32, %v630_v33 }
 0x103   : > { %1821 = vmatmul.mubr.msk.f32.gmra.mxu0 %vm798_vm10, %v2538_v46  ;;  %1816 = vmatmul.mubr.msk.f32.gmra.mxu1 %vm798_vm10, %v2668_v37  ;;  %v459_v34 = vsel %vm452_vm7, %v449_v7, %v451_v16 }
 0x104   : > { %v653_v35 = vpop.permute.xlu1 %652  ;;  %1185 = vmatprep.mubr.f32.mxu0 %v2171_v24  ;;  %1090 = vmatprep.mubr.f32.mxu1 %v2171_v24  ;;  %v676_v40 = vsel %vm669_vm5, %v2394_v30, %v459_v34 }
 0x105   : > { %v661_v12 = vsel %vm654_vm3, %v651_v49, %v653_v35 }
 0x106   : > { %v490_v38 = vpop.permute.xlu0 %489  ;;  %v713_v39 = vsel %vm685_vm6, %v706_v36, %v661_v12 }
 0x107   : > { %v498_v41 = vsel %vm491_vm8, %v488_v54, %v490_v38  ;;  %1887 = vmatprep.subr.mxu1 %v713_v39  ;;  %1822 = vmatmul.mubr.msk.f32.gmra.mxu0 %vm798_vm10, %v2556_v50 }
 0x108   : > { %1888 = vmatpush3.msra.mxu1 %v713_v39  ;;  %v529_v10 = vpop.permute.xlu1 %528  ;;  %v684_v7 = vsel %vm677_vm4, %v676_v40, %v498_v41  ;;  %1191 = vmatprep.mubr.f32.mxu0 %v2171_v24 }
 0x109   : > { %v537_v44 = vsel %vm530_vm9, %v527_v22, %v529_v10  ;;  %1817 = vmatmul.mubr.msk.f32.gmra.mxu1 %vm798_vm10, %v2519_v42 }
 0x10a   : > { %v692_v48 = vsel %vm685_vm6, %v684_v7, %v537_v44  ;;  %1096 = vmatprep.mubr.f32.mxu1 %v2171_v24 }
 0x10b   : > { %1889 = vmatprep.subr.mxu1 %v692_v48  ;;  %1823 = vmatmul.mubr.msk.f32.gmra.mxu0 %vm798_vm10, %v2574_v56 }
 0x10c   : > { %1890 = vmatpush3.msra.mxu1 %v692_v48  ;;  %1197 = vmatprep.mubr.f32.mxu0 %v2171_v24 }
 0x10d   : > { %1818 = vmatmul.mubr.msk.f32.gmra.mxu1 %vm798_vm10, %v2543_v47 }
 0x10e   : > { %1102 = vmatprep.mubr.f32.mxu1 %v2171_v24 }
 0x10f   : > { %1824 = vmatmul.mubr.msk.f32.gmra.mxu0 %vm798_vm10, %v2586_v61 }
 0x110   : > { %1203 = vmatprep.mubr.f32.mxu0 %v2171_v24 }
 0x111   : > { %1819 = vmatmul.mubr.msk.f32.gmra.mxu1 %vm798_vm10, %v2561_v51 }
 0x112   : > { %1891 = vmatprep.mubr.msk.f32.mxu1 %vm798_vm10, %v2524_v43 }
 0x113   : > { %1825 = vmatmul.mubr.msk.f32.gmra.mxu0 %vm798_vm10, %v2613_v52  ;;  %v2819_v43 = vpop.permute.xlu0 %740 }
 0x114   : > { %1209 = vmatprep.mubr.f32.mxu0 %v2171_v24 }
 0x115   : > { %1892 = vmatmul.mubr.msk.f32.vlgmr.msra.gmra.mxu1 %vm798_vm10, %v2538_v46  ;;  %v2817_v30 = vpop.permute.xlu1 %745 }
 0x116   : > { %1894 = vmatprep.mubr.msk.f32.mxu1 %vm798_vm10, %v2556_v50 }
 0x117   : > { %1826 = vmatmul.mubr.msk.f32.gmra.mxu0 %vm798_vm10, %v2628_v19  ;;  %v2823_v46 = vpop.permute.xlu0 %755 }
 0x118   : > { %1215 = vmatprep.mubr.f32.mxu0 %v2171_v24 }
 0x119   : > { %1895 = vmatmul.mubr.msk.f32.gmra.mxu1 %vm798_vm10, %v2574_v56 }
 0x11a   : > { %1897 = vmatprep.mubr.msk.f32.mxu1 %vm798_vm10, %v2586_v61 }
 0x11b   : > { %1827 = vmatmul.mubr.msk.f32.gmra.mxu0 %vm798_vm10, %v2653_v20 }
 0x11c   : > { %1221 = vmatprep.mubr.f32.mxu0 %v2171_v24 }
 0x11d   : > { %1898 = vmatmul.mubr.msk.f32.gmra.mxu1 %vm798_vm10, %v2613_v52 }
 0x11e   : > { %1900 = vmatprep.mubr.msk.f32.mxu1 %vm798_vm10, %v2628_v19 }
 0x11f   : > { %1828 = vmatmul.mubr.msk.f32.gmra.mxu0 %vm798_vm10, %v2668_v37 }
 0x120   : > { %1227 = vmatprep.mubr.f32.mxu0 %v2171_v24 }
 0x121   : > { %1901 = vmatmul.mubr.msk.f32.gmra.mxu1 %vm798_vm10, %v2653_v20 }
 0x122   : > { %1903 = vmatprep.mubr.msk.f32.mxu1 %vm798_vm10, %v2668_v37 }
 0x123   : > { %1829 = vmatmul.mubr.msk.f32.gmra.mxu0 %vm798_vm10, %v2519_v42 }
 0x124   : > { %1233 = vmatprep.mubr.f32.mxu0 %v2171_v24 }
 0x125   : > { %1904 = vmatmul.mubr.msk.f32.gmra.mxu1 %vm798_vm10, %v2519_v42  ;;  %v2821_v42 = vpop.permute.xlu1 %750 }
 0x126   : > { %1906 = vmatprep.mubr.msk.f32.mxu1 %vm798_vm10, %v2543_v47 }
 0x127   : > { %1830 = vmatmul.mubr.msk.f32.gmra.mxu0 %vm798_vm10, %v2543_v47 }
 0x128   : > { %1239 = vmatprep.mubr.f32.mxu0 %v2171_v24  ;;  %v2831_v24 = vpop.permute.xlu0 %765 }
 0x129   : > { %1907 = vmatmul.mubr.msk.f32.gmra.mxu1 %vm798_vm10, %v2561_v51  ;;  %v2829_v47 = vpop.permute.xlu1 %760 }
 0x12b   : > { %1831 = vmatmul.mubr.msk.f32.gmra.mxu0 %vm798_vm10, %v2561_v51 }
 0x12c   : > { %v2835_v56 = vpop.permute.xlu0 %775 }
 0x12d   : > { %v2833_v50 = vpop.permute.xlu1 %770 }
 0x130   : > { %v2843_v61 = vpop.permute.xlu0 %785 }
 0x131   : > { %v2837_v51 = vpop.permute.xlu1 %780 }
 0x134   : > { %v2861_v45 = vpop.permute.xlu0 %795 }
 0x135   : > { %v2847_v53 = vpop.permute.xlu1 %790 }
 0x186   : > { %v901_v52 = vpop.f32.mrf.mxu0  ;;  %v955_v19 = vpop.f32.mrf.mxu1 }
 0x187   : > { %v902_v20 = vadd.f32 %v901_v52, %v2819_v43  ;;  %v956_v37 = vadd.f32 %v955_v19, %v2843_v61 }
 0x188   : > { %v903_v57 = vpop.f32.mrf.mxu0  ;;  %v957_v60 = vpop.f32.mrf.mxu1 }
 0x189   : > { %v904_v63 = vadd.f32 %v903_v57, %v2819_v43  ;;  %v1371_v0 = vmax.f32 %v902_v20, 0.0  ;;  %v958_v1 = vadd.f32 %v957_v60, %v2843_v61  ;;  %v1434_v2 = vmax.f32 %v956_v37, 0.0 }
 0x18a   : > { %v907_v49 = vpop.f32.mrf.mxu0  ;;  %v961_v3 = vpop.f32.mrf.mxu1 }
 0x18b   : > { %v1372_v4 = vmax.f32 %v904_v63, 0.0  ;;  %1455 = vst [vmem:[%s2852_s19] sm:$0xff] %v1371_v0  ;;  %v908_v6 = vadd.f32 %v907_v49, %v2817_v30  ;;  %v1435_v55 = vmax.f32 %v958_v1, 0.0  ;;  %1518 = vst [vmem:[%s2857_s24 + $0x38] sm:$0xff] %v1434_v2  ;;  %v962_v8 = vadd.f32 %v961_v3, %v2847_v53 }
 0x18c   : > { %v909_v9 = vpop.f32.mrf.mxu0  ;;  %v963_v54 = vpop.f32.mrf.mxu1 }
 0x18d   : > { %1456 = vst [vmem:[%s2852_s19 + $0x8] sm:$0xff] %v1372_v4  ;;  %v1378_v11 = vmax.f32 %v908_v6, 0.0  ;;  %v910_v58 = vadd.f32 %v909_v9, %v2817_v30  ;;  %1519 = vst [vmem:[%s2857_s24 + $0x40] sm:$0xff] %v1435_v55  ;;  %v964_v5 = vadd.f32 %v963_v54, %v2847_v53  ;;  %v1441_v13 = vmax.f32 %v962_v8, 0.0 }
 0x18e   : > { %v913_v14 = vpop.f32.mrf.mxu0  ;;  %v967_v15 = vpop.f32.mrf.mxu1 }
 0x18f   : > { %1462 = vst [vmem:[%s2852_s19 + $0x38] sm:$0xff] %v1378_v11  ;;  %v1379_v18 = vmax.f32 %v910_v58, 0.0  ;;  %v914_v22 = vadd.f32 %v913_v14, %v2821_v42  ;;  %v1442_v23 = vmax.f32 %v964_v5, 0.0  ;;  %1525 = vst [vmem:[%s2857_s24 + $0x70] sm:$0xff] %v1441_v13  ;;  %v968_v59 = vadd.f32 %v967_v15, %v2861_v45 }
 0x190   : > { %v915_v25 = vpop.f32.mrf.mxu0  ;;  %v969_v26 = vpop.f32.mrf.mxu1 }
 0x191   : > { %1463 = vst [vmem:[%s2852_s19 + $0x40] sm:$0xff] %v1379_v18  ;;  %v1385_v17 = vmax.f32 %v914_v22, 0.0  ;;  %v916_v27 = vadd.f32 %v915_v25, %v2821_v42  ;;  %1526 = vst [vmem:[%s2857_s24 + $0x78] sm:$0xff] %v1442_v23  ;;  %v970_v29 = vadd.f32 %v969_v26, %v2861_v45  ;;  %v1448_v28 = vmax.f32 %v968_v59, 0.0 }
 0x192   : > { %v919_v21 = vpop.f32.mrf.mxu0 }
 0x193   : > { %1469 = vst [vmem:[%s2852_s19 + $0x70] sm:$0xff] %v1385_v17  ;;  %v1386_v31 = vmax.f32 %v916_v27, 0.0  ;;  %v920_v62 = vadd.f32 %v919_v21, %v2823_v46  ;;  %v1449_v32 = vmax.f32 %v970_v29, 0.0  ;;  %1532 = vst [vmem:[%s2857_s24 + $0xa8] sm:$0xff] %v1448_v28 }
 0x194   : > { %v921_v33 = vpop.f32.mrf.mxu0 }
 0x195   : > { %1470 = vst [vmem:[%s2852_s19 + $0x78] sm:$0xff] %v1386_v31  ;;  %v1392_v16 = vmax.f32 %v920_v62, 0.0  ;;  %v922_v34 = vadd.f32 %v921_v33, %v2823_v46  ;;  %1533 = vst [vmem:[%s2857_s24 + $0xb0] sm:$0xff] %v1449_v32 }
 0x196   : > { %v925_v35 = vpop.f32.mrf.mxu0 }
 0x197   : > { %1476 = vst [vmem:[%s2852_s19 + $0xa8] sm:$0xff] %v1392_v16  ;;  %v1393_v12 = vmax.f32 %v922_v34, 0.0  ;;  %v926_v36 = vadd.f32 %v925_v35, %v2829_v47 }
 0x198   : > { %v927_v38 = vpop.f32.mrf.mxu0 }
 0x199   : > { %1477 = vst [vmem:[%s2852_s19 + $0xb0] sm:$0xff] %v1393_v12  ;;  %v1399_v39 = vmax.f32 %v926_v36, 0.0  ;;  %v928_v40 = vadd.f32 %v927_v38, %v2829_v47 }
 0x19a   : > { %v931_v41 = vpop.f32.mrf.mxu0 }
 0x19b   : > { %1483 = vst [vmem:[%s2886_s9] sm:$0xff] %v1399_v39  ;;  %v1400_v10 = vmax.f32 %v928_v40, 0.0  ;;  %v932_v7 = vadd.f32 %v931_v41, %v2831_v24 }
 0x19c   : > { %v933_v44 = vpop.f32.mrf.mxu0 }
 0x19d   : > { %1484 = vst [vmem:[%s2886_s9 + $0x8] sm:$0xff] %v1400_v10  ;;  %v1406_v48 = vmax.f32 %v932_v7, 0.0  ;;  %v934_v52 = vadd.f32 %v933_v44, %v2831_v24 }
 0x19e   : > { %v937_v19 = vpop.f32.mrf.mxu0 }
 0x19f   : > { %1490 = vst [vmem:[%s2886_s9 + $0x38] sm:$0xff] %v1406_v48  ;;  %v1407_v20 = vmax.f32 %v934_v52, 0.0  ;;  %v938_v37 = vadd.f32 %v937_v19, %v2833_v50 }
 0x1a0   : > { %v939_v57 = vpop.f32.mrf.mxu0 }
 0x1a1   : > { %1491 = vst [vmem:[%s2886_s9 + $0x40] sm:$0xff] %v1407_v20  ;;  %v1413_v60 = vmax.f32 %v938_v37, 0.0  ;;  %v940_v63 = vadd.f32 %v939_v57, %v2833_v50 }
 0x1a2   : > { %v943_v0 = vpop.f32.mrf.mxu0 }
 0x1a3   : > { %v1038_v1 = vpop.f32.mrf.mxu1  ;;  %1497 = vst [vmem:[%s2886_s9 + $0x70] sm:$0xff] %v1413_v60  ;;  %v1414_v2 = vmax.f32 %v940_v63, 0.0  ;;  %v944_v49 = vadd.f32 %v943_v0, %v2835_v56 }
 0x1a4   : > { %v1039_v3 = vadd.f32 %v1038_v1, %v2819_v43  ;;  %v945_v4 = vpop.f32.mrf.mxu0 }
 0x1a5   : > { %v1040_v6 = vpop.f32.mrf.mxu1  ;;  %1498 = vst [vmem:[%s2886_s9 + $0x78] sm:$0xff] %v1414_v2  ;;  %v1420_v55 = vmax.f32 %v944_v49, 0.0  ;;  %v946_v8 = vadd.f32 %v945_v4, %v2835_v56 }
 0x1a6   : > { %v1373_v9 = vmax.f32 %v1039_v3, 0.0  ;;  %v1041_v54 = vadd.f32 %v1040_v6, %v2819_v43  ;;  %v949_v11 = vpop.f32.mrf.mxu0 }
 0x1a7   : > { %v1044_v58 = vpop.f32.mrf.mxu1  ;;  %1504 = vst [vmem:[%s2886_s9 + $0xa8] sm:$0xff] %v1420_v55  ;;  %v1421_v5 = vmax.f32 %v946_v8, 0.0  ;;  %v950_v13 = vadd.f32 %v949_v11, %v2837_v51 }
 0x1a8   : > { %1457 = vst [vmem:[%s2852_s19 + $0x10] sm:$0xff] %v1373_v9  ;;  %v1374_v14 = vmax.f32 %v1041_v54, 0.0  ;;  %v1045_v15 = vadd.f32 %v1044_v58, %v2817_v30  ;;  %v951_v18 = vpop.f32.mrf.mxu0 }
 0x1a9   : > { %v1046_v22 = vpop.f32.mrf.mxu1  ;;  %1505 = vst [vmem:[%s2886_s9 + $0xb0] sm:$0xff] %v1421_v5  ;;  %v1427_v23 = vmax.f32 %v950_v13, 0.0  ;;  %v952_v59 = vadd.f32 %v951_v18, %v2837_v51 }
 0x1aa   : > { %1458 = vst [vmem:[%s2852_s19 + $0x18] sm:$0xff] %v1374_v14  ;;  %v1380_v25 = vmax.f32 %v1045_v15, 0.0  ;;  %v1047_v26 = vadd.f32 %v1046_v22, %v2817_v30 }
 0x1ab   : > { %v1050_v17 = vpop.f32.mrf.mxu1  ;;  %1511 = vst [vmem:[%s2857_s24] sm:$0xff] %v1427_v23  ;;  %v1428_v27 = vmax.f32 %v952_v59, 0.0 }
 0x1ac   : > { %1464 = vst [vmem:[%s2852_s19 + $0x48] sm:$0xff] %v1380_v25  ;;  %v1381_v29 = vmax.f32 %v1047_v26, 0.0  ;;  %v1051_v28 = vadd.f32 %v1050_v17, %v2821_v42 }
 0x1ad   : > { %v1052_v21 = vpop.f32.mrf.mxu1  ;;  %1512 = vst [vmem:[%s2857_s24 + $0x8] sm:$0xff] %v1428_v27 }
 0x1ae   : > { %1465 = vst [vmem:[%s2852_s19 + $0x50] sm:$0xff] %v1381_v29  ;;  %v1387_v31 = vmax.f32 %v1051_v28, 0.0  ;;  %v1053_v62 = vadd.f32 %v1052_v21, %v2821_v42 }
 0x1af   : > { %v1056_v32 = vpop.f32.mrf.mxu1 }
 0x1b0   : > { %1471 = vst [vmem:[%s2852_s19 + $0x80] sm:$0xff] %v1387_v31  ;;  %v1388_v33 = vmax.f32 %v1053_v62, 0.0  ;;  %v1057_v16 = vadd.f32 %v1056_v32, %v2823_v46 }
 0x1b1   : > { %v1058_v34 = vpop.f32.mrf.mxu1 }
 0x1b2   : > { %1472 = vst [vmem:[%s2852_s19 + $0x88] sm:$0xff] %v1388_v33  ;;  %v1394_v35 = vmax.f32 %v1057_v16, 0.0  ;;  %v1059_v12 = vadd.f32 %v1058_v34, %v2823_v46 }
 0x1b3   : > { %v1062_v36 = vpop.f32.mrf.mxu1 }
 0x1b4   : > { %1478 = vst [vmem:[%s2852_s19 + $0xb8] sm:$0xff] %v1394_v35  ;;  %v1395_v38 = vmax.f32 %v1059_v12, 0.0  ;;  %v1063_v39 = vadd.f32 %v1062_v36, %v2829_v47 }
 0x1b5   : > { %v1064_v40 = vpop.f32.mrf.mxu1 }
 0x1b6   : > { %1479 = vst [vmem:[%s2852_s19 + $0xc0] sm:$0xff] %v1395_v38  ;;  %v1401_v41 = vmax.f32 %v1063_v39, 0.0  ;;  %v1065_v10 = vadd.f32 %v1064_v40, %v2829_v47 }
 0x1b7   : > { %v1068_v7 = vpop.f32.mrf.mxu1 }
 0x1b8   : > { %1485 = vst [vmem:[%s2886_s9 + $0x10] sm:$0xff] %v1401_v41  ;;  %v1402_v44 = vmax.f32 %v1065_v10, 0.0  ;;  %v1069_v48 = vadd.f32 %v1068_v7, %v2831_v24 }
 0x1b9   : > { %v1070_v52 = vpop.f32.mrf.mxu1 }
 0x1ba   : > { %1486 = vst [vmem:[%s2886_s9 + $0x18] sm:$0xff] %v1402_v44  ;;  %v1408_v19 = vmax.f32 %v1069_v48, 0.0  ;;  %v1071_v20 = vadd.f32 %v1070_v52, %v2831_v24 }
 0x1bb   : > { %v1074_v37 = vpop.f32.mrf.mxu1 }
 0x1bc   : > { %1492 = vst [vmem:[%s2886_s9 + $0x48] sm:$0xff] %v1408_v19  ;;  %v1409_v57 = vmax.f32 %v1071_v20, 0.0  ;;  %v1075_v60 = vadd.f32 %v1074_v37, %v2833_v50 }
 0x1bd   : > { %v1076_v63 = vpop.f32.mrf.mxu1 }
 0x1be   : > { %1493 = vst [vmem:[%s2886_s9 + $0x50] sm:$0xff] %v1409_v57  ;;  %v1415_v0 = vmax.f32 %v1075_v60, 0.0  ;;  %v1077_v1 = vadd.f32 %v1076_v63, %v2833_v50 }
 0x1bf   : > { %v1175_v2 = vpop.f32.mrf.mxu0  ;;  %v1080_v49 = vpop.f32.mrf.mxu1 }
 0x1c0   : > { %1499 = vst [vmem:[%s2886_s9 + $0x80] sm:$0xff] %v1415_v0  ;;  %v1176_v3 = vadd.f32 %v1175_v2, %v2819_v43  ;;  %v1416_v4 = vmax.f32 %v1077_v1, 0.0  ;;  %v1081_v6 = vadd.f32 %v1080_v49, %v2835_v56 }
 0x1c1   : > { %v1177_v55 = vpop.f32.mrf.mxu0  ;;  %v1082_v8 = vpop.f32.mrf.mxu1 }
 0x1c2   : > { %v1375_v9 = vmax.f32 %v1176_v3, 0.0  ;;  %1500 = vst [vmem:[%s2886_s9 + $0x88] sm:$0xff] %v1416_v4  ;;  %v1178_v54 = vadd.f32 %v1177_v55, %v2819_v43  ;;  %v1422_v11 = vmax.f32 %v1081_v6, 0.0  ;;  %v1083_v58 = vadd.f32 %v1082_v8, %v2835_v56 }
 0x1c3   : > { %v1181_v5 = vpop.f32.mrf.mxu0  ;;  %v1086_v13 = vpop.f32.mrf.mxu1 }
 0x1c4   : > { %1459 = vst [vmem:[%s2852_s19 + $0x20] sm:$0xff] %v1375_v9  ;;  %v1376_v14 = vmax.f32 %v1178_v54, 0.0  ;;  %1506 = vst [vmem:[%s2886_s9 + $0xb8] sm:$0xff] %v1422_v11  ;;  %v1182_v15 = vadd.f32 %v1181_v5, %v2817_v30  ;;  %v1423_v18 = vmax.f32 %v1083_v58, 0.0  ;;  %v1087_v22 = vadd.f32 %v1086_v13, %v2837_v51 }
 0x1c5   : > { %v1183_v23 = vpop.f32.mrf.mxu0  ;;  %v1088_v59 = vpop.f32.mrf.mxu1 }
 0x1c6   : > { %1460 = vst [vmem:[%s2852_s19 + $0x28] sm:$0xff] %v1376_v14  ;;  %v1382_v25 = vmax.f32 %v1182_v15, 0.0  ;;  %1507 = vst [vmem:[%s2886_s9 + $0xc0] sm:$0xff] %v1423_v18  ;;  %v1184_v26 = vadd.f32 %v1183_v23, %v2817_v30  ;;  %v1429_v17 = vmax.f32 %v1087_v22, 0.0  ;;  %v1089_v27 = vadd.f32 %v1088_v59, %v2837_v51 }
 0x1c7   : > { %v1187_v29 = vpop.f32.mrf.mxu0 }
 0x1c8   : > { %1466 = vst [vmem:[%s2852_s19 + $0x58] sm:$0xff] %v1382_v25  ;;  %v1383_v28 = vmax.f32 %v1184_v26, 0.0  ;;  %1513 = vst [vmem:[%s2857_s24 + $0x10] sm:$0xff] %v1429_v17  ;;  %v1188_v21 = vadd.f32 %v1187_v29, %v2821_v42  ;;  %v1430_v31 = vmax.f32 %v1089_v27, 0.0 }
 0x1c9   : > { %v1189_v62 = vpop.f32.mrf.mxu0  ;;  %v1092_v32 = vpop.f32.mrf.mxu1 }
 0x1ca   : > { %1467 = vst [vmem:[%s2852_s19 + $0x60] sm:$0xff] %v1383_v28  ;;  %v1389_v33 = vmax.f32 %v1188_v21, 0.0  ;;  %1514 = vst [vmem:[%s2857_s24 + $0x18] sm:$0xff] %v1430_v31  ;;  %v1190_v16 = vadd.f32 %v1189_v62, %v2821_v42  ;;  %v1093_v34 = vadd.f32 %v1092_v32, %v2843_v61 }
 0x1cb   : > { %v1193_v35 = vpop.f32.mrf.mxu0  ;;  %v1094_v12 = vpop.f32.mrf.mxu1 }
 0x1cc   : > { %1473 = vst [vmem:[%s2852_s19 + $0x90] sm:$0xff] %v1389_v33  ;;  %v1390_v36 = vmax.f32 %v1190_v16, 0.0  ;;  %v1436_v38 = vmax.f32 %v1093_v34, 0.0  ;;  %v1194_v39 = vadd.f32 %v1193_v35, %v2823_v46  ;;  %v1095_v40 = vadd.f32 %v1094_v12, %v2843_v61 }
 0x1cd   : > { %v1195_v41 = vpop.f32.mrf.mxu0  ;;  %v1098_v10 = vpop.f32.mrf.mxu1 }
 0x1ce   : > { %1474 = vst [vmem:[%s2852_s19 + $0x98] sm:$0xff] %v1390_v36  ;;  %1520 = vst [vmem:[%s2857_s24 + $0x48] sm:$0xff] %v1436_v38  ;;  %v1396_v7 = vmax.f32 %v1194_v39, 0.0  ;;  %v1437_v44 = vmax.f32 %v1095_v40, 0.0  ;;  %v1196_v48 = vadd.f32 %v1195_v41, %v2823_v46  ;;  %v1099_v52 = vadd.f32 %v1098_v10, %v2847_v53 }
 0x1cf   : > { %v1199_v19 = vpop.f32.mrf.mxu0  ;;  %v1100_v20 = vpop.f32.mrf.mxu1 }
 0x1d0   : > { %1480 = vst [vmem:[%s2852_s19 + $0xc8] sm:$0xff] %v1396_v7  ;;  %1521 = vst [vmem:[%s2857_s24 + $0x50] sm:$0xff] %v1437_v44  ;;  %v1397_v37 = vmax.f32 %v1196_v48, 0.0  ;;  %v1443_v57 = vmax.f32 %v1099_v52, 0.0  ;;  %v1200_v60 = vadd.f32 %v1199_v19, %v2829_v47  ;;  %v1101_v63 = vadd.f32 %v1100_v20, %v2847_v53 }
 0x1d1   : > { %v1201_v0 = vpop.f32.mrf.mxu0  ;;  %v1104_v1 = vpop.f32.mrf.mxu1 }
 0x1d2   : > { %1481 = vst [vmem:[%s2852_s19 + $0xd0] sm:$0xff] %v1397_v37  ;;  %1527 = vst [vmem:[%s2857_s24 + $0x80] sm:$0xff] %v1443_v57  ;;  %v1403_v2 = vmax.f32 %v1200_v60, 0.0  ;;  %v1444_v49 = vmax.f32 %v1101_v63, 0.0  ;;  %v1202_v3 = vadd.f32 %v1201_v0, %v2829_v47  ;;  %v1105_v4 = vadd.f32 %v1104_v1, %v2861_v45 }
 0x1d3   : > { %v1205_v6 = vpop.f32.mrf.mxu0  ;;  %v1106_v55 = vpop.f32.mrf.mxu1 }
 0x1d4   : > { %1487 = vst [vmem:[%s2886_s9 + $0x20] sm:$0xff] %v1403_v2  ;;  %1528 = vst [vmem:[%s2857_s24 + $0x88] sm:$0xff] %v1444_v49  ;;  %v1404_v8 = vmax.f32 %v1202_v3, 0.0  ;;  %v1450_v9 = vmax.f32 %v1105_v4, 0.0  ;;  %v1206_v54 = vadd.f32 %v1205_v6, %v2831_v24  ;;  %v1107_v11 = vadd.f32 %v1106_v55, %v2861_v45 }
 0x1d5   : > { %v1207_v58 = vpop.f32.mrf.mxu0  ;;  %v1893_v5 = vpop.f32.mrf.mxu1 }
 0x1d6   : > { %1488 = vst [vmem:[%s2886_s9 + $0x28] sm:$0xff] %v1404_v8  ;;  %1534 = vst [vmem:[%s2857_s24 + $0xb8] sm:$0xff] %v1450_v9  ;;  %v1410_v13 = vmax.f32 %v1206_v54, 0.0  ;;  %v1451_v14 = vmax.f32 %v1107_v11, 0.0  ;;  %v1208_v15 = vadd.f32 %v1207_v58, %v2831_v24  ;;  %v1318_v18 = vadd.f32 %v1893_v5, %v2817_v30 }
 0x1d7   : > { %v1211_v22 = vpop.f32.mrf.mxu0  ;;  %v1312_v23 = vpop.f32.mrf.mxu1 }
 0x1d8   : > { %1494 = vst [vmem:[%s2886_s9 + $0x58] sm:$0xff] %v1410_v13  ;;  %1535 = vst [vmem:[%s2857_s24 + $0xc0] sm:$0xff] %v1451_v14  ;;  %v1411_v59 = vmax.f32 %v1208_v15, 0.0  ;;  %v1212_v25 = vadd.f32 %v1211_v22, %v2833_v50  ;;  %v1384_v26 = vmax.f32 %v1318_v18, 0.0  ;;  %v1313_v17 = vadd.f32 %v1312_v23, %v2819_v43 }
 0x1d9   : > { %v1213_v27 = vpop.f32.mrf.mxu0  ;;  %v1896_v29 = vpop.f32.mrf.mxu1 }
 0x1da   : > { %1495 = vst [vmem:[%s2886_s9 + $0x60] sm:$0xff] %v1411_v59  ;;  %v1417_v28 = vmax.f32 %v1212_v25, 0.0  ;;  %1468 = vst [vmem:[%s2852_s19 + $0x68] sm:$0xff] %v1384_v26  ;;  %v1214_v30 = vadd.f32 %v1213_v27, %v2833_v50  ;;  %v1377_v21 = vmax.f32 %v1313_v17, 0.0  ;;  %v1328_v31 = vadd.f32 %v1896_v29, %v2823_v46 }
 0x1db   : > { %v1217_v62 = vpop.f32.mrf.mxu0  ;;  %v1322_v32 = vpop.f32.mrf.mxu1 }
 0x1dc   : > { %1501 = vst [vmem:[%s2886_s9 + $0x90] sm:$0xff] %v1417_v28  ;;  %v1418_v33 = vmax.f32 %v1214_v30, 0.0  ;;  %1461 = vst [vmem:[%s2852_s19 + $0x30] sm:$0xff] %v1377_v21  ;;  %v1218_v43 = vadd.f32 %v1217_v62, %v2835_v56  ;;  %v1398_v16 = vmax.f32 %v1328_v31, 0.0  ;;  %v1323_v34 = vadd.f32 %v1322_v32, %v2821_v42 }
 0x1dd   : > { %v1219_v35 = vpop.f32.mrf.mxu0  ;;  %v1899_v12 = vpop.f32.mrf.mxu1 }
 0x1de   : > { %1502 = vst [vmem:[%s2886_s9 + $0x98] sm:$0xff] %v1418_v33  ;;  %v1424_v36 = vmax.f32 %v1218_v43, 0.0  ;;  %1482 = vst [vmem:[%s2852_s19 + $0xd8] sm:$0xff] %v1398_v16  ;;  %v1220_v46 = vadd.f32 %v1219_v35, %v2835_v56  ;;  %v1391_v38 = vmax.f32 %v1323_v34, 0.0  ;;  %v1338_v39 = vadd.f32 %v1899_v12, %v2831_v24 }
 0x1df   : > { %v1223_v40 = vpop.f32.mrf.mxu0  ;;  %v1332_v41 = vpop.f32.mrf.mxu1 }
 0x1e0   : > { %1508 = vst [vmem:[%s2886_s9 + $0xc8] sm:$0xff] %v1424_v36  ;;  %v1425_v10 = vmax.f32 %v1220_v46, 0.0  ;;  %1475 = vst [vmem:[%s2852_s19 + $0xa0] sm:$0xff] %v1391_v38  ;;  %v1224_v42 = vadd.f32 %v1223_v40, %v2837_v51  ;;  %v1412_v7 = vmax.f32 %v1338_v39, 0.0  ;;  %v1333_v44 = vadd.f32 %v1332_v41, %v2829_v47 }
 0x1e1   : > { %v1225_v48 = vpop.f32.mrf.mxu0  ;;  %v1902_v52 = vpop.f32.mrf.mxu1 }
 0x1e2   : > { %1509 = vst [vmem:[%s2886_s9 + $0xd0] sm:$0xff] %v1425_v10  ;;  %v1431_v19 = vmax.f32 %v1224_v42, 0.0  ;;  %1496 = vst [vmem:[%s2886_s9 + $0x68] sm:$0xff] %v1412_v7  ;;  %v1226_v24 = vadd.f32 %v1225_v48, %v2837_v51  ;;  %v1405_v20 = vmax.f32 %v1333_v44, 0.0  ;;  %v1348_v37 = vadd.f32 %v1902_v52, %v2835_v56 }
 0x1e3   : > { %v1229_v57 = vpop.f32.mrf.mxu0  ;;  %v1342_v60 = vpop.f32.mrf.mxu1 }
 0x1e4   : > { %1515 = vst [vmem:[%s2857_s24 + $0x20] sm:$0xff] %v1431_v19  ;;  %v1432_v63 = vmax.f32 %v1226_v24, 0.0  ;;  %1489 = vst [vmem:[%s2886_s9 + $0x30] sm:$0xff] %v1405_v20  ;;  %v1230_v47 = vadd.f32 %v1229_v57, %v2843_v61  ;;  %v1426_v0 = vmax.f32 %v1348_v37, 0.0  ;;  %v1343_v1 = vadd.f32 %v1342_v60, %v2833_v50 }
 0x1e5   : > { %v1231_v2 = vpop.f32.mrf.mxu0  ;;  %v1905_v49 = vpop.f32.mrf.mxu1 }
 0x1e6   : > { %1516 = vst [vmem:[%s2857_s24 + $0x28] sm:$0xff] %v1432_v63  ;;  %v1438_v3 = vmax.f32 %v1230_v47, 0.0  ;;  %1510 = vst [vmem:[%s2886_s9 + $0xd8] sm:$0xff] %v1426_v0  ;;  %v1232_v56 = vadd.f32 %v1231_v2, %v2843_v61  ;;  %v1419_v4 = vmax.f32 %v1343_v1, 0.0  ;;  %v1358_v6 = vadd.f32 %v1905_v49, %v2843_v61 }
 0x1e7   : > { %v1235_v55 = vpop.f32.mrf.mxu0  ;;  %v1352_v8 = vpop.f32.mrf.mxu1 }
 0x1e8   : > { %1522 = vst [vmem:[%s2857_s24 + $0x58] sm:$0xff] %v1438_v3  ;;  %v1439_v9 = vmax.f32 %v1232_v56, 0.0  ;;  %1503 = vst [vmem:[%s2886_s9 + $0xa0] sm:$0xff] %v1419_v4  ;;  %v1236_v50 = vadd.f32 %v1235_v55, %v2847_v53  ;;  %v1440_v54 = vmax.f32 %v1358_v6, 0.0  ;;  %v1353_v11 = vadd.f32 %v1352_v8, %v2837_v51 }
 0x1e9   : > { %v1237_v58 = vpop.f32.mrf.mxu0  ;;  %v1908_v5 = vpop.f32.mrf.mxu1 }
 0x1ea   : > { %1523 = vst [vmem:[%s2857_s24 + $0x60] sm:$0xff] %v1439_v9  ;;  %v1445_v13 = vmax.f32 %v1236_v50, 0.0  ;;  %1524 = vst [vmem:[%s2857_s24 + $0x68] sm:$0xff] %v1440_v54  ;;  %v1238_v61 = vadd.f32 %v1237_v58, %v2847_v53  ;;  %v1433_v14 = vmax.f32 %v1353_v11, 0.0  ;;  %v1368_v15 = vadd.f32 %v1908_v5, %v2861_v45 }
 0x1eb   : > { %v1241_v18 = vpop.f32.mrf.mxu0  ;;  %v1362_v22 = vpop.f32.mrf.mxu1 }
 0x1ec   : > { %1529 = vst [vmem:[%s2857_s24 + $0x90] sm:$0xff] %v1445_v13  ;;  %v1446_v51 = vmax.f32 %v1238_v61, 0.0  ;;  %1517 = vst [vmem:[%s2857_s24 + $0x30] sm:$0xff] %v1433_v14  ;;  %v1242_v23 = vadd.f32 %v1241_v18, %v2861_v45  ;;  %v1454_v59 = vmax.f32 %v1368_v15, 0.0  ;;  %v1363_v25 = vadd.f32 %v1362_v22, %v2847_v53 }
 0x1ed   : > { %v1243_v26 = vpop.f32.mrf.mxu0 }
 0x1ee   : > { %1530 = vst [vmem:[%s2857_s24 + $0x98] sm:$0xff] %v1446_v51  ;;  %v1452_v17 = vmax.f32 %v1242_v23, 0.0  ;;  %1538 = vst [vmem:[%s2857_s24 + $0xd8] sm:$0xff] %v1454_v59  ;;  %v1244_v27 = vadd.f32 %v1243_v26, %v2861_v45  ;;  %v1447_v29 = vmax.f32 %v1363_v25, 0.0  ;;  %1556 = sbr.rel (!%p2270_p3) target bundleno = 528 (0x210), region = 40 }
 0x1f0   : > { %1536 = vst [vmem:[%s2857_s24 + $0xc8] sm:$0xff] %v1452_v17  ;;  %v1453_v28 = vmax.f32 %v1244_v27, 0.0  ;;  %1531 = vst [vmem:[%s2857_s24 + $0xa0] sm:$0xff] %v1447_v29 }
 0x1f2   : > { %1537 = vst [vmem:[%s2857_s24 + $0xd0] sm:$0xff] %v1453_v28 }
 0x1f3   : > { %s3264_s20 = smov (!%p1559_p1, %s1558_s20), 7 }
 0x1f4   : > { %s3039_s14 = sshll.u32 %s3264_s20, 9 }
 0x1f5   : > { %s1563_s18 = ssub.s32 3584, %s3039_s14 }
 0x1f6   : > { %1564 = vsyncadd %s3028_s29, %s1563_s18  ;;  %p1845_p2 = scmp.ne.s32.totalorder %s3039_s14, 0  ;;  %s1846_s17 = sshll.u32 %s2149_s25, 5 }
 0x1f7   : > { %s1567_s12 = sadd.s32 %s1846_s17, %s2293_s16  ;;  %s1848_s13 = sshll.u32 %s3264_s20, 3 }
 0x1f8   : > { %s1847_s0 = sshll.u32 %s1567_s12, 7  ;;  %s1572_s1 = sshll.u32 %s2852_s19, 4  ;;  %s3053_s1 = int_to_ptr.vmem [resolvable:$true] %s1572_s1 }
 0x1f9   : > { %s3051_s8 = scalar_lea.hbm %s3211_s4, %s1847_s0  ;;  %s2013_s18 = scalar_lea.vmem %s3053_s1, %s3039_s14 }
 0x1fa   : > { %p2014_p4 = scmp.ne.s32.totalorder %s3053_s1, %s2013_s18  ;;  %s2173_s7 = smov [#allocation2]  }
 0x1fb   : > { %s2017_s17 = sshll.u32 %s2173_s7, 4  ;;  %s2018_s17 = int_to_ptr.vmem [resolvable:$false] %s2017_s17 }
 0x1fc   : > { %p2015_p5 = pnand %p2014_p4, %p1845_p2  ;;  %s2019_s12 = scalar_lea.vmem %s2018_s17, 7168 }
 0x1fd   : > { %p2020_p7 = scmp.lt.s32.totalorder %s3053_s1, %s2018_s17  ;;  %p2021_p9 = scmp.lt.s32.totalorder %s2019_s12, %s2013_s18 }
 0x1fe   : > { %p2016_p6 = pneg %p2015_p5 }
 0x1ff   : > { %p2022_p10 = por %p2021_p9, %p2020_p7 }
 0x201   : > { %p2023_p11 = pnand %p2022_p10, %p2016_p6 }
 0x203   : > { %2026 = shalt.err (!%p2023_p11)
}
 0x204   : > { %s2027_s0 = scalar_lea.hbm %s3051_s8, %s3039_s14  ;;  %s2031_s7 = scalar_lea.hbm %s3211_s4, 8192 }
 0x205   : > { %p2028_p12 = scmp.ne.s32.totalorder %s3051_s8, %s2027_s0  ;;  %p2032_p1 = scmp.lt.s32.totalorder %s3051_s8, %s3211_s4 }
 0x206   : > { %p2033_p4 = scmp.lt.s32.totalorder %s2031_s7, %s2027_s0 }
 0x207   : > { %p2029_p13 = pnand %p2028_p12, %p1845_p2 }
 0x208   : > { %p2034_p5 = por %p2033_p4, %p2032_p1 }
 0x209   : > { %p2030_p0 = pneg %p2029_p13 }
 0x20b   : > { %p2035_p6 = pnand %p2034_p5, %p2030_p0 }
 0x20d   : > { %2038 = shalt.err (!%p2035_p6)
}
 0x20e   : > { %s2174_s18 = smov 896   ;;  %s2175_s12 = smov 1024  }
 0x20f   : > { %1578 = dma.vmem_to_hbm [thread:$0]  (%p1845_p2), %s3053_s1, %s3039_s14, %s3051_s8, %s3028_s29, %s2174_s18, %s2175_s12, %s1848_s13  }
 0x210 PF: > { %1581 = sbr.rel (!%p2270_p3) target bundleno = 562 (0x232), region = 44  ;;  %s1583_s0 = ssub.s32 (%p2270_p3), 8, %s2293_s16 }
 0x211   : > { %p1584_p7 = scmp.lt.s32.totalorder (%p2270_p3), %s1583_s0, 7 }
 0x215   : > { %s3266_s0 = smov (!%p1584_p7, %s1583_s0), 7 }
 0x216   : > { %s3087_s2 = sshll.u32 %s3266_s0, 9 }
 0x217   : > { %s1588_s3 = ssub.s32 3584, %s3087_s2 }
 0x218   : > { %1589 = vsyncadd %s3031_s30, %s1588_s3  ;;  %p1852_p2 = scmp.ne.s32.totalorder %s3087_s2, 0  ;;  %s1853_s1 = sshll.u32 %s2149_s25, 5 }
 0x219   : > { %s1592_s8 = sadd.s32 %s1853_s1, %s2293_s16  ;;  %s1855_s29 = sshll.u32 %s3266_s0, 3 }
 0x21a   : > { %s1854_s20 = sshll.u32 %s1592_s8, 7  ;;  %s1597_s14 = sshll.u32 %s2886_s9, 4  ;;  %s3101_s14 = int_to_ptr.vmem [resolvable:$true] %s1597_s14 }
 0x21b   : > { %s3099_s19 = scalar_lea.hbm %s3212_s5, %s1854_s20  ;;  %s2039_s17 = scalar_lea.vmem %s3101_s14, %s3087_s2 }
 0x21c   : > { %p2040_p9 = scmp.ne.s32.totalorder %s3101_s14, %s2039_s17  ;;  %s2176_s18 = smov [#allocation4]  }
 0x21d   : > { %s2043_s12 = sshll.u32 %s2176_s18, 4  ;;  %s2044_s12 = int_to_ptr.vmem [resolvable:$false] %s2043_s12 }
 0x21e   : > { %p2041_p10 = pnand %p2040_p9, %p1852_p2  ;;  %s2045_s3 = scalar_lea.vmem %s2044_s12, 7168 }
 0x21f   : > { %p2046_p12 = scmp.lt.s32.totalorder %s3101_s14, %s2044_s12  ;;  %p2047_p13 = scmp.lt.s32.totalorder %s2045_s3, %s2039_s17 }
 0x220   : > { %p2042_p11 = pneg %p2041_p10 }
 0x221   : > { %p2048_p0 = por %p2047_p13, %p2046_p12 }
 0x223   : > { %p2049_p1 = pnand %p2048_p0, %p2042_p11 }
 0x225   : > { %2052 = shalt.err (!%p2049_p1)
}
 0x226   : > { %s2053_s9 = scalar_lea.hbm %s3099_s19, %s3087_s2  ;;  %s2057_s20 = scalar_lea.hbm %s3212_s5, 8192 }
 0x227   : > { %p2054_p4 = scmp.ne.s32.totalorder %s3099_s19, %s2053_s9  ;;  %p2058_p7 = scmp.lt.s32.totalorder %s3099_s19, %s3212_s5 }
 0x228   : > { %p2059_p9 = scmp.lt.s32.totalorder %s2057_s20, %s2053_s9 }
 0x229   : > { %p2055_p5 = pnand %p2054_p4, %p1852_p2 }
 0x22a   : > { %p2060_p10 = por %p2059_p9, %p2058_p7 }
 0x22b   : > { %p2056_p6 = pneg %p2055_p5 }
 0x22d   : > { %p2061_p11 = pnand %p2060_p10, %p2056_p6 }
 0x22f   : > { %2064 = shalt.err (!%p2061_p11)
}
 0x230   : > { %s2177_s17 = smov 896   ;;  %s2178_s18 = smov 1024  }
 0x231   : > { %1603 = dma.vmem_to_hbm [thread:$0]  (%p1852_p2), %s3101_s14, %s3087_s2, %s3099_s19, %s3031_s30, %s2177_s17, %s2178_s18, %s1855_s29  }
 0x232 PF: > { %1606 = sbr.rel (!%p2270_p3) target bundleno = 596 (0x254), region = 48  ;;  %s1608_s12 = ssub.s32 (%p2270_p3), 8, %s2293_s16 }
 0x233   : > { %p1609_p12 = scmp.lt.s32.totalorder (%p2270_p3), %s1608_s12, 7 }
 0x237   : > { %s3268_s12 = smov (!%p1609_p12, %s1608_s12), 7 }
 0x238   : > { %s3135_s3 = sshll.u32 %s3268_s12, 9 }
 0x239   : > { %s1613_s9 = ssub.s32 3584, %s3135_s3 }
 0x23a   : > { %1614 = vsyncadd %s3031_s30, %s1613_s9  ;;  %p1859_p3 = scmp.ne.s32.totalorder %s3135_s3, 0  ;;  %s1860_s10 = sshll.u32 %s2149_s25, 5 }
 0x23b   : > { %s1617_s0 = sadd.s32 %s1860_s10, %s2293_s16  ;;  %s1862_s2 = sshll.u32 %s3268_s12, 3 }
 0x23c   : > { %s1861_s29 = sshll.u32 %s1617_s0, 7  ;;  %s1622_s14 = sshll.u32 %s2857_s24, 4  ;;  %s3149_s14 = int_to_ptr.vmem [resolvable:$true] %s1622_s14 }
 0x23d   : > { %s3147_s8 = scalar_lea.hbm %s3213_s6, %s1861_s29  ;;  %s2065_s20 = scalar_lea.vmem %s3149_s14, %s3135_s3 }
 0x23e   : > { %p2066_p2 = scmp.ne.s32.totalorder %s3149_s14, %s2065_s20  ;;  %s2179_s25 = smov [#allocation6]  }
 0x23f   : > { %s2069_s16 = sshll.u32 %s2179_s25, 4  ;;  %s2070_s16 = int_to_ptr.vmem [resolvable:$false] %s2069_s16 }
 0x240   : > { %p2067_p13 = pnand %p2066_p2, %p1859_p3  ;;  %s2071_s13 = scalar_lea.vmem %s2070_s16, 7168 }
 0x241   : > { %p2072_p1 = scmp.lt.s32.totalorder %s3149_s14, %s2070_s16  ;;  %p2073_p4 = scmp.lt.s32.totalorder %s2071_s13, %s2065_s20 }
 0x242   : > { %p2068_p0 = pneg %p2067_p13 }
 0x243   : > { %p2074_p5 = por %p2073_p4, %p2072_p1 }
 0x245   : > { %p2075_p6 = pnand %p2074_p5, %p2068_p0 }
 0x247   : > { %2078 = shalt.err (!%p2075_p6)
}
 0x248   : > { %s2079_s24 = scalar_lea.hbm %s3147_s8, %s3135_s3  ;;  %s2083_s18 = scalar_lea.hbm %s3213_s6, 8192 }
 0x249   : > { %p2080_p7 = scmp.ne.s32.totalorder %s3147_s8, %s2079_s24  ;;  %p2084_p11 = scmp.lt.s32.totalorder %s3147_s8, %s3213_s6 }
 0x24a   : > { %p2085_p12 = scmp.lt.s32.totalorder %s2083_s18, %s2079_s24 }
 0x24b   : > { %p2081_p9 = pnand %p2080_p7, %p1859_p3 }
 0x24c   : > { %p2086_p2 = por %p2085_p12, %p2084_p11 }
 0x24d   : > { %p2082_p10 = pneg %p2081_p9 }
 0x24f   : > { %p2087_p13 = pnand %p2086_p2, %p2082_p10 }
 0x251   : > { %2090 = shalt.err (!%p2087_p13)
}
 0x252   : > { %s2180_s0 = smov 896   ;;  %s2181_s29 = smov 1024  }
 0x253   : > { %1628 = dma.vmem_to_hbm [thread:$0]  (%p1859_p3), %s3149_s14, %s3135_s3, %s3147_s8, %s3031_s30, %s2180_s0, %s2181_s29, %s1862_s2  }
 0x254 PF: > { %p1928_p0 = scmp.ge.s32.totalorder %s2161_s28, 2  ;;  %s1637_s19 = sand.u32 1, %s2133_s21  }
 0x255   : > { %s1638_s1 = scalar_lea.sflag [#allocation3], %s1637_s19 }
 0x256   : > { %p1919_p1 = pnand %p1928_p0, %p2281_p8 }
 0x258   : > { %p1920_p4 = pneg %p1919_p1 }
 0x25a   : > { %2124 = dma.done.wait (%p1920_p4), %s1638_s1, 3584  }
 0x25b   : > { %2126 = vsyncadd (%p1920_p4), %s1638_s1, 4294963712  ;;  %s3245_s20 = sadd.s32 4294967294, %s2161_s28  }
 0x25c   : > { %s1646_s25 = sand.u32 1, %s3245_s20  }
 0x25d   : > { %s1647_s16 = scalar_lea.sflag [#allocation5], %s1646_s25 }
 0x25e   : > { %2128 = dma.done.wait (%p1920_p4), %s1647_s16, 7168  }
 0x25f   : > { %2130 = vsyncadd (%p1920_p4), %s1647_s16, 4294960128  ;;  %s23_s28 = sadd.s32 1, %s2161_s28   ;;  %s3246_s11 = sld [smem:[#allocation9_spill]] }
 0x260   : > { %p20_p3 = scmp.ge.s32.totalorder %s23_s28, 6   ;;  %s3247_s30 = sld [smem:[#allocation10_spill]] }
 0x261   : > { %s3248_s21 = smov %s2137_s22  ;;  %s3249_s22 = smov %s2141_s23 }
 0x262   : > { %s3250_s23 = smov %s2290_s15  ;;  %s3251_s24 = smov %s2153_s26 }
 0x263   : > { %s3252_s25 = smov %s2157_s27  ;;  %22 = sbr.rel (!%p20_p3) target bundleno = 12 (0xc), region = 106 }
 0x265   : > { %s3253_s26 = smov %s3246_s11 }
 0x266   : > { %s3254_s27 = smov %s3247_s30 }
 0x268   :  { %1661 = vsyncpa [#allocation3], 1 }
 0x269   :  { %1663 = vsyncpa [#allocation3 + $0x1], 1 }
 0x26a   :  { %1664 = vsyncpa [#allocation5], 1 }
 0x26b   :  { %1666 = vsyncpa [#allocation5 + $0x1], 1 }

</bundles_post_ra>
